<compile_context>
chip_gen: v7x
topology: tpu7x:2x2x1
jax: 0.10.0
libtpu: 0.0.40
codegen_flags: <defaults>
</compile_context>

<pallas_src>
import functools

import jax
import jax.numpy as jnp
from jax.experimental import pallas as pl
from jax.experimental.pallas import tpu as pltpu


def _round_up(x, m):
    return ((x + m - 1) // m) * m


def mlp_kernel(x_ref, w1_ref, b1_ref, w2_ref, b2_ref, w3_ref, b3_ref, o_ref,
               *, d_out):
    # Whole hot path (3 matmuls + ReLUs + log_softmax) fused in one kernel.
    # Matmuls accumulate in f32; elementwise work stays in f32.
    x = x_ref[...]

    h1 = jnp.dot(x, w1_ref[...], preferred_element_type=jnp.float32) + b1_ref[...]
    h1 = jnp.maximum(h1, 0.0)

    h2 = jnp.dot(h1.astype(w2_ref.dtype), w2_ref[...],
                 preferred_element_type=jnp.float32) + b2_ref[...]
    h2 = jnp.maximum(h2, 0.0)

    h3 = jnp.dot(h2.astype(w3_ref.dtype), w3_ref[...],
                 preferred_element_type=jnp.float32) + b3_ref[...]
    h3 = jnp.maximum(h3, 0.0)

    # Mask padded logit lanes (>= d_out) so they vanish from the softmax sum/max.
    col = jax.lax.broadcasted_iota(jnp.int32, h3.shape, dimension=1)
    h3 = jnp.where(col < d_out, h3, -1e30)

    # log_softmax over the feature axis (dim=1 in PyTorch).
    m = jnp.max(h3, axis=-1, keepdims=True)
    s = h3 - m
    lse = jnp.log(jnp.sum(jnp.exp(s), axis=-1, keepdims=True))
    o_ref[...] = (s - lse).astype(o_ref.dtype)


@functools.partial(jax.jit, static_argnames=("block_b", "compute_dtype"))
def feed_forward(x, w1, b1, w2, b2, w3, b3, *, block_b=256,
                 compute_dtype=jnp.float32):
    """block_b: batch tile. 128 is a good v5e default; 256+ for v6e/v7x.
    compute_dtype: jnp.float32 or jnp.bfloat16 (matmul operands only; biases,
    accumulation, ReLU and log_softmax stay in f32)."""
    B = x.shape[0]
    x2d = x.reshape(B, -1).astype(jnp.float32)          # x.view(x.shape[0], -1)
    D_in = x2d.shape[1]                                  # 784
    H1 = w1.shape[1]                                     # 256
    H2 = w2.shape[1]                                     # 64
    D_out = w3.shape[1]                                  # 10

    # Pad contraction dim of the dominant first matmul to a multiple of 128.
    K_pad = _round_up(D_in, 128)                         # 896
    if K_pad != D_in:
        x2d = jnp.pad(x2d, ((0, 0), (0, K_pad - D_in)))
        w1p = jnp.pad(w1, ((0, K_pad - D_in), (0, 0)))
    else:
        w1p = w1

    # Lane-dense output: pad the final layer to 128 columns with zeros.
    N_pad = _round_up(max(D_out, 128), 128)              # 128
    w3p = jnp.pad(w3, ((0, 0), (0, N_pad - D_out)))
    b3p = jnp.pad(b3, ((0, N_pad - D_out),))

    # Batch tile (multiple of 8) and zero-padded batch so the tail tile never
    # feeds unspecified rows through exp/log.
    blk = max(8, _round_up(min(block_b, _round_up(B, 8)), 8))
    B_pad = _round_up(B, blk)
    if B_pad != B:
        x2d = jnp.pad(x2d, ((0, B_pad - B), (0, 0)))

    # Matmul operands in compute_dtype (bf16 halves the per-step x DMA and hits
    # the native MXU rate on v6e/v7x); biases stay f32.
    xc = x2d.astype(compute_dtype)
    w1c = w1p.astype(compute_dtype)
    w2c = w2.astype(compute_dtype)
    w3c = w3p.astype(compute_dtype)
    b1r = b1.astype(jnp.float32).reshape(1, H1)
    b2r = b2.astype(jnp.float32).reshape(1, H2)
    b3r = b3p.astype(jnp.float32).reshape(1, N_pad)

    grid = (pl.cdiv(B_pad, blk),)

    itemsize = jnp.dtype(compute_dtype).itemsize
    cost = pl.CostEstimate(
        flops=2 * B_pad * (K_pad * H1 + H1 * H2 + H2 * N_pad),
        transcendentals=B_pad * (N_pad + 1),
        bytes_accessed=(B_pad * K_pad * itemsize
                        + (K_pad * H1 + H1 * H2 + H2 * N_pad) * itemsize
                        + (H1 + H2 + N_pad) * 4
                        + B_pad * N_pad * 4),
    )

    out = pl.pallas_call(
        functools.partial(mlp_kernel, d_out=D_out),
        out_shape=jax.ShapeDtypeStruct((B_pad, N_pad), jnp.float32),
        grid_spec=pltpu.PrefetchScalarGridSpec(
            num_scalar_prefetch=0,
            grid=grid,
            in_specs=[
                pl.BlockSpec((blk, K_pad), lambda i: (i, 0)),    # x tile (streamed)
                pl.BlockSpec((K_pad, H1), lambda i: (0, 0)),     # w1 (resident)
                pl.BlockSpec((1, H1), lambda i: (0, 0)),         # b1
                pl.BlockSpec((H1, H2), lambda i: (0, 0)),        # w2 (resident)
                pl.BlockSpec((1, H2), lambda i: (0, 0)),         # b2
                pl.BlockSpec((H2, N_pad), lambda i: (0, 0)),     # w3 (resident)
                pl.BlockSpec((1, N_pad), lambda i: (0, 0)),      # b3
            ],
            out_specs=pl.BlockSpec((blk, N_pad), lambda i: (i, 0)),
        ),
        compiler_params=pltpu.CompilerParams(
            dimension_semantics=("parallel",),
            vmem_limit_bytes=32 * 1024 * 1024,
        ),
        cost_estimate=cost,
    )(xc, w1c, b1r, w2c, b2r, w3c, b3r)

    # Drop batch padding and the padded logit lanes.
    return out[:B, :D_out]


def init_params(key):
    # Deterministic synthetic init (shapes from nn.Linear(784,256/256,64/64,10)).
    k1, k2, k3, k4, k5, k6 = jax.random.split(key, 6)
    w1 = jax.random.normal(k1, (784, 256), jnp.float32) * 0.02
    b1 = jax.random.normal(k2, (256,), jnp.float32) * 0.02
    w2 = jax.random.normal(k3, (256, 64), jnp.float32) * 0.02
    b2 = jax.random.normal(k4, (64,), jnp.float32) * 0.02
    w3 = jax.random.normal(k5, (64, 10), jnp.float32) * 0.02
    b3 = jax.random.normal(k6, (10,), jnp.float32) * 0.02
    return w1, b1, w2, b2, w3, b3


def feed_forward_ref(x, w1, b1, w2, b2, w3, b3):
    # Pure-JAX reference of the PyTorch forward (for sanity checking).
    x = x.reshape(x.shape[0], -1)
    x = jnp.maximum(x @ w1 + b1, 0.0)
    x = jnp.maximum(x @ w2 + b2, 0.0)
    x = jnp.maximum(x @ w3 + b3, 0.0)
    return jax.nn.log_softmax(x, axis=1)


if __name__ == "__main__":
    key = jax.random.PRNGKey(0)
    kx, kp = jax.random.split(key)

    # MNIST-like batch: NCHW (256, 1, 28, 28) -> flattened to (256, 784).
    B = 256
    x = jax.random.normal(kx, (B, 1, 28, 28), jnp.float32)
    params = init_params(kp)
    ref = feed_forward_ref(x, *params)

    # f32 path; block_b=128 gives a 2-step batch grid (both v7x TCs get work).
    out_f32 = jax.block_until_ready(
        feed_forward(x, *params, block_b=128, compute_dtype=jnp.float32))
    assert out_f32.shape == (B, 10), out_f32.shape
    assert jnp.allclose(out_f32, ref, atol=1e-5, rtol=1e-5), "f32 mismatch vs ref"

    # bf16 operands with f32 accumulation (v6e/v7x MXU fast path).
    out_bf16 = jax.block_until_ready(
        feed_forward(x, *params, block_b=128, compute_dtype=jnp.bfloat16))
    assert out_bf16.shape == (B, 10), out_bf16.shape
    assert jnp.allclose(out_bf16, ref, atol=5e-2, rtol=5e-2), "bf16 mismatch vs ref"

    # Ragged batch (not a multiple of the tile) exercises the zero-padded tail.
    out_tail = jax.block_until_ready(feed_forward(x[:100], *params, block_b=128))
    assert out_tail.shape == (100, 10), out_tail.shape
    assert jnp.allclose(out_tail, ref[:100], atol=1e-5, rtol=1e-5), "tail mismatch"

    print("KERNEL_OK")
</pallas_src>

<mosaic_0001>
module attributes {stable_mosaic.version = 11 : i64} {
  func.func @mlp_kernel(%arg0: i32, %arg1: memref<128x896xf32, #tpu.memory_space<vmem>>, %arg2: memref<896x256xf32, #tpu.memory_space<vmem>>, %arg3: memref<1x256xf32, #tpu.memory_space<vmem>>, %arg4: memref<256x64xf32, #tpu.memory_space<vmem>>, %arg5: memref<1x64xf32, #tpu.memory_space<vmem>>, %arg6: memref<64x128xf32, #tpu.memory_space<vmem>>, %arg7: memref<1x128xf32, #tpu.memory_space<vmem>>, %arg8: memref<128x128xf32, #tpu.memory_space<vmem>>) attributes {dimension_semantics = [#tpu.dimension_semantics<parallel>], iteration_bounds = array<i64: 2>, scalar_prefetch = 0 : i64, scratch_operands = 0 : i64, tpu.core_type = #tpu.core_type<tc>, window_params = [{transform_indices = @transform_0, window_bounds = array<i64: 128, 896>}, {pipeline_mode = #tpu.pipeline_mode<synchronous>, transform_indices = @transform_1, window_bounds = array<i64: 896, 256>}, {pipeline_mode = #tpu.pipeline_mode<synchronous>, transform_indices = @transform_2, window_bounds = array<i64: 1, 256>}, {pipeline_mode = #tpu.pipeline_mode<synchronous>, transform_indices = @transform_3, window_bounds = array<i64: 256, 64>}, {pipeline_mode = #tpu.pipeline_mode<synchronous>, transform_indices = @transform_4, window_bounds = array<i64: 1, 64>}, {pipeline_mode = #tpu.pipeline_mode<synchronous>, transform_indices = @transform_5, window_bounds = array<i64: 64, 128>}, {pipeline_mode = #tpu.pipeline_mode<synchronous>, transform_indices = @transform_6, window_bounds = array<i64: 1, 128>}, {transform_indices = @transform_7, window_bounds = array<i64: 128, 128>}]} {
    %c0 = arith.constant 0 : index
    %c0_0 = arith.constant 0 : index
    %0 = vector.load %arg1[%c0, %c0_0] : memref<128x896xf32, #tpu.memory_space<vmem>>, vector<128x896xf32>
    %c0_1 = arith.constant 0 : index
    %c0_2 = arith.constant 0 : index
    %1 = vector.load %arg2[%c0_1, %c0_2] : memref<896x256xf32, #tpu.memory_space<vmem>>, vector<896x256xf32>
    %cst = arith.constant dense<0.000000e+00> : vector<128x256xf32>
    %2 = tpu.matmul %0, %1, %cst {dimension_numbers = #tpu.dot_dimension_numbers<[1], [0], [0], [1], [0, 0, 1, 1], [], []>} : vector<128x896xf32>, vector<896x256xf32>, vector<128x256xf32> -> vector<128x256xf32>
    %c0_3 = arith.constant 0 : index
    %c0_4 = arith.constant 0 : index
    %3 = vector.load %arg3[%c0_3, %c0_4] : memref<1x256xf32, #tpu.memory_space<vmem>>, vector<1x256xf32>
    %4 = vector.broadcast %3 : vector<1x256xf32> to vector<128x256xf32>
    %5 = arith.addf %2, %4 : vector<128x256xf32>
    %cst_5 = arith.constant 0.000000e+00 : f32
    %6 = vector.broadcast %cst_5 : f32 to vector<128x256xf32>
    %7 = arith.maximumf %5, %6 : vector<128x256xf32>
    %c0_6 = arith.constant 0 : index
    %c0_7 = arith.constant 0 : index
    %8 = vector.load %arg4[%c0_6, %c0_7] : memref<256x64xf32, #tpu.memory_space<vmem>>, vector<256x64xf32>
    %cst_8 = arith.constant dense<0.000000e+00> : vector<128x64xf32>
    %9 = tpu.matmul %7, %8, %cst_8 {dimension_numbers = #tpu.dot_dimension_numbers<[1], [0], [0], [1], [0, 0, 1, 1], [], []>} : vector<128x256xf32>, vector<256x64xf32>, vector<128x64xf32> -> vector<128x64xf32>
    %c0_9 = arith.constant 0 : index
    %c0_10 = arith.constant 0 : index
    %10 = vector.load %arg5[%c0_9, %c0_10] : memref<1x64xf32, #tpu.memory_space<vmem>>, vector<1x64xf32>
    %11 = vector.broadcast %10 : vector<1x64xf32> to vector<128x64xf32>
    %12 = arith.addf %9, %11 : vector<128x64xf32>
    %cst_11 = arith.constant 0.000000e+00 : f32
    %13 = vector.broadcast %cst_11 : f32 to vector<128x64xf32>
    %14 = arith.maximumf %12, %13 : vector<128x64xf32>
    %c0_12 = arith.constant 0 : index
    %c0_13 = arith.constant 0 : index
    %15 = vector.load %arg6[%c0_12, %c0_13] : memref<64x128xf32, #tpu.memory_space<vmem>>, vector<64x128xf32>
    %cst_14 = arith.constant dense<0.000000e+00> : vector<128x128xf32>
    %16 = tpu.matmul %14, %15, %cst_14 {dimension_numbers = #tpu.dot_dimension_numbers<[1], [0], [0], [1], [0, 0, 1, 1], [], []>} : vector<128x64xf32>, vector<64x128xf32>, vector<128x128xf32> -> vector<128x128xf32>
    %c0_15 = arith.constant 0 : index
    %c0_16 = arith.constant 0 : index
    %17 = vector.load %arg7[%c0_15, %c0_16] : memref<1x128xf32, #tpu.memory_space<vmem>>, vector<1x128xf32>
    %18 = vector.broadcast %17 : vector<1x128xf32> to vector<128x128xf32>
    %19 = arith.addf %16, %18 : vector<128x128xf32>
    %cst_17 = arith.constant 0.000000e+00 : f32
    %20 = vector.broadcast %cst_17 : f32 to vector<128x128xf32>
    %21 = arith.maximumf %19, %20 : vector<128x128xf32>
    %22 = tpu.iota {dimensions = array<i32: 1>} : vector<128x128xi32>
    %c10_i32 = arith.constant 10 : i32
    %23 = vector.broadcast %c10_i32 : i32 to vector<128x128xi32>
    %24 = arith.cmpi slt, %22, %23 : vector<128x128xi32>
    %cst_18 = arith.constant -1.000000e+30 : f32
    %25 = vector.broadcast %cst_18 : f32 to vector<128x128xf32>
    %26 = arith.select %24, %21, %25 : vector<128x128xi1>, vector<128x128xf32>
    %cst_19 = arith.constant dense<0xFF800000> : vector<128xf32>
    %27 = vector.multi_reduction <maximumf>, %26, %cst_19 [1] : vector<128x128xf32> to vector<128xf32>
    %28 = vector.shape_cast %27 : vector<128xf32> to vector<128x1xf32>
    %29 = vector.broadcast %28 : vector<128x1xf32> to vector<128x128xf32>
    %30 = arith.subf %26, %29 : vector<128x128xf32>
    %31 = math.exp %30 : vector<128x128xf32>
    %cst_20 = arith.constant dense<0.000000e+00> : vector<128xf32>
    %32 = vector.multi_reduction <add>, %31, %cst_20 [1] : vector<128x128xf32> to vector<128xf32>
    %33 = vector.shape_cast %32 : vector<128xf32> to vector<128x1xf32>
    %34 = math.log %33 : vector<128x1xf32>
    %35 = vector.broadcast %34 : vector<128x1xf32> to vector<128x128xf32>
    %36 = arith.subf %30, %35 : vector<128x128xf32>
    %c0_21 = arith.constant 0 : index
    %c0_22 = arith.constant 0 : index
    %37 = vector.load %arg8[%c0_21, %c0_22] : memref<128x128xf32, #tpu.memory_space<vmem>>, vector<128x128xf32>
    tpu.vector_store %arg8[%c0_21, %c0_22], %36 {strides = array<i32>} : memref<128x128xf32, #tpu.memory_space<vmem>>, vector<128x128xf32>,
    return
  }
  func.func @transform_0(%arg0: i32) -> (i32, i32) {
    %c0_i32 = arith.constant 0 : i32
    %c0_i32_0 = arith.constant 0 : i32
    return %arg0, %c0_i32 : i32, i32
  }
  func.func @transform_1(%arg0: i32) -> (i32, i32) {
    %c0_i32 = arith.constant 0 : i32
    %c0_i32_0 = arith.constant 0 : i32
    %c0_i32_1 = arith.constant 0 : i32
    return %c0_i32, %c0_i32_0 : i32, i32
  }
  func.func @transform_2(%arg0: i32) -> (i32, i32) {
    %c0_i32 = arith.constant 0 : i32
    %c0_i32_0 = arith.constant 0 : i32
    %c0_i32_1 = arith.constant 0 : i32
    return %c0_i32, %c0_i32_0 : i32, i32
  }
  func.func @transform_3(%arg0: i32) -> (i32, i32) {
    %c0_i32 = arith.constant 0 : i32
    %c0_i32_0 = arith.constant 0 : i32
    %c0_i32_1 = arith.constant 0 : i32
    return %c0_i32, %c0_i32_0 : i32, i32
  }
  func.func @transform_4(%arg0: i32) -> (i32, i32) {
    %c0_i32 = arith.constant 0 : i32
    %c0_i32_0 = arith.constant 0 : i32
    %c0_i32_1 = arith.constant 0 : i32
    return %c0_i32, %c0_i32_0 : i32, i32
  }
  func.func @transform_5(%arg0: i32) -> (i32, i32) {
    %c0_i32 = arith.constant 0 : i32
    %c0_i32_0 = arith.constant 0 : i32
    %c0_i32_1 = arith.constant 0 : i32
    return %c0_i32, %c0_i32_0 : i32, i32
  }
  func.func @transform_6(%arg0: i32) -> (i32, i32) {
    %c0_i32 = arith.constant 0 : i32
    %c0_i32_0 = arith.constant 0 : i32
    %c0_i32_1 = arith.constant 0 : i32
    return %c0_i32, %c0_i32_0 : i32, i32
  }
  func.func @transform_7(%arg0: i32) -> (i32, i32) {
    %c0_i32 = arith.constant 0 : i32
    %c0_i32_0 = arith.constant 0 : i32
    return %arg0, %c0_i32 : i32, i32
  }
}

</mosaic_0001>

<bundles_post_ra>
// kernel: feed_forward.1
= control target key start
LH: loop header
LB: loop body
LE: loop exit
PB: predicated region body
PF: predicated region fallthrough
CT: control target
= control target key end

     0   :  { %s2681_s24 = smov 0   ;;  %s3966_s0 = inlined_call_operand.vmem [shape: f32[256,896], index: 0, kind: input, shape index: {}]   ;;  %s3967_s1 = inlined_call_operand.vmem [shape: f32[896,256], index: 1, kind: input, shape index: {}]   ;;  %s3968_s2 = inlined_call_operand.vmem [shape: f32[1,256], index: 2, kind: input, shape index: {}]   ;;  %s3969_s3 = inlined_call_operand.vmem [shape: f32[256,64], index: 3, kind: input, shape index: {}]   ;;  %s3970_s4 = inlined_call_operand.vmem [shape: f32[1,64], index: 4, kind: input, shape index: {}]   ;;  %s3971_s5 = inlined_call_operand.vmem [shape: f32[64,128], index: 5, kind: input, shape index: {}]   ;;  %s3972_s6 = inlined_call_operand.vmem [shape: f32[1,128], index: 6, kind: input, shape index: {}]   ;;  %s3973_s7 = inlined_call_operand.vmem [shape: f32[256,128], index: 7, kind: output, shape index: {}]  }
   0x1 LB: > { %s1985_s25 = sadd.s32 4294967295, %s2638_s24   ;;  %p1989_p0 = scmp.ge.s32.totalorder %s2638_s24, 1  ;;  %s2638_s24 = sphi %s2681_s24, %s17_s24  }
   0x2   : > { %p239_p1 = scmp.lt.s32.totalorder %s2638_s24, 3 }
   0x4   : > { %p240_p2 = pnand %p1989_p0, %p239_p1 }
   0x5   : > { %v462_v0 = vld [vmem:[%s3967_s1 + $0x208] sm:$0xff] (!%p240_p2)  ;;  %v464_v1 = vld [vmem:[%s3967_s1 + $0x218] sm:$0xff] (!%p240_p2)  ;;  %v461_v2 = vld [vmem:[%s3967_s1 + $0x200] sm:$0xff] (!%p240_p2)  ;;  %s1990_s23 = sshll.u32 (!%p240_p2), %s1985_s25, 4  ;;  %vm1524_vm0 = vcmask (!%p240_p2), 523264  }
   0x6   : > { %243 = sbr.rel (%p240_p2) target bundleno = 1230 (0x4ce), region = 48  ;;  %v2222_v3 = vpack.c.bf16 (!%p240_p2), %v464_v1, %v462_v0  ;;  %v463_v4 = vld [vmem:[%s3967_s1 + $0x210] sm:$0xff] (!%p240_p2)  ;;  %v466_v5 = vld [vmem:[%s3967_s1 + $0x228] sm:$0xff] (!%p240_p2)  ;;  %v468_v6 = vld [vmem:[%s3967_s1 + $0x238] sm:$0xff] (!%p240_p2)  ;;  %p273_p3 = scmp.lt.s32.totalorder (!%p240_p2), %s1990_s23, 31 }
   0x7   : > { %v2224_v7 = vpack.c.bf16 (!%p240_p2), %v463_v4, %v461_v2  ;;  %v2226_v8 = vpack.c.bf16 (!%p240_p2), %v468_v6, %v466_v5  ;;  %v465_v9 = vld [vmem:[%s3967_s1 + $0x220] sm:$0xff] (!%p240_p2)  ;;  %v467_v10 = vld [vmem:[%s3967_s1 + $0x230] sm:$0xff] (!%p240_p2)  ;;  %v470_v11 = vld [vmem:[%s3967_s1 + $0x248] sm:$0xff] (!%p240_p2) }
   0x8   : > { %2223 = vmatprep.subr.bf16.mxu0 (!%p240_p2), %v2222_v3  ;;  %v472_v12 = vld [vmem:[%s3967_s1 + $0x258] sm:$0xff] (!%p240_p2)  ;;  %v2228_v13 = vpack.c.bf16 (!%p240_p2), %v467_v10, %v465_v9  ;;  %v469_v15 = vld [vmem:[%s3967_s1 + $0x240] sm:$0xff] (!%p240_p2)  ;;  %v471_v16 = vld [vmem:[%s3967_s1 + $0x250] sm:$0xff] (!%p240_p2) }
   0x9   : > { %2225 = vmatpush1.bf16.msra.mxu0 (!%p240_p2), %v2224_v7  ;;  %v2230_v14 = vpack.c.bf16 (!%p240_p2), %v472_v12, %v470_v11  ;;  %v474_v17 = vld [vmem:[%s3967_s1 + $0x268] sm:$0xff] (!%p240_p2)  ;;  %v476_v18 = vld [vmem:[%s3967_s1 + $0x278] sm:$0xff] (!%p240_p2)  ;;  %v2232_v19 = vpack.c.bf16 (!%p240_p2), %v471_v16, %v469_v15  ;;  %v473_v21 = vld [vmem:[%s3967_s1 + $0x260] sm:$0xff] (!%p240_p2) }
   0xa   : > { %2227 = vmatprep.subr.bf16.mxu0 (!%p240_p2), %v2226_v8  ;;  %v2234_v20 = vpack.c.bf16 (!%p240_p2), %v476_v18, %v474_v17  ;;  %v475_v22 = vld [vmem:[%s3967_s1 + $0x270] sm:$0xff] (!%p240_p2)  ;;  %v478_v23 = vld [vmem:[%s3967_s1 + $0x288] sm:$0xff] (!%p240_p2)  ;;  %v480_v24 = vld [vmem:[%s3967_s1 + $0x298] sm:$0xff] (!%p240_p2) }
   0xb   : > { %v2236_v25 = vpack.c.bf16 (!%p240_p2), %v475_v22, %v473_v21  ;;  %v2238_v26 = vpack.c.bf16 (!%p240_p2), %v480_v24, %v478_v23  ;;  %v477_v27 = vld [vmem:[%s3967_s1 + $0x280] sm:$0xff] (!%p240_p2)  ;;  %v479_v28 = vld [vmem:[%s3967_s1 + $0x290] sm:$0xff] (!%p240_p2)  ;;  %v482_v29 = vld [vmem:[%s3967_s1 + $0x2a8] sm:$0xff] (!%p240_p2) }
   0xc   : > { %v484_v30 = vld [vmem:[%s3967_s1 + $0x2b8] sm:$0xff] (!%p240_p2)  ;;  %v2240_v31 = vpack.c.bf16 (!%p240_p2), %v479_v28, %v477_v27  ;;  %v481_v33 = vld [vmem:[%s3967_s1 + $0x2a0] sm:$0xff] (!%p240_p2)  ;;  %v483_v34 = vld [vmem:[%s3967_s1 + $0x2b0] sm:$0xff] (!%p240_p2) }
   0xd   : > { %2229 = vmatpush1.bf16.msra.mxu0 %v2228_v13  ;;  %s3975_s23 = smov (!%p273_p3, %s1990_s23), 31  ;;  %v2242_v32 = vpack.c.bf16 %v484_v30, %v482_v29  ;;  %v486_v35 = vld [vmem:[%s3967_s1 + $0x2c8] sm:$0xff]  ;;  %v488_v36 = vld [vmem:[%s3967_s1 + $0x2d8] sm:$0xff]  ;;  %v2244_v37 = vpack.c.bf16 %v483_v34, %v481_v33  ;;  %v485_v39 = vld [vmem:[%s3967_s1 + $0x2c0] sm:$0xff] }
   0xe   : > { %2231 = vmatprep.subr.bf16.mxu0 %v2230_v14  ;;  %s2558_s29 = smul.u32 56, %s3975_s23  ;;  %v2246_v38 = vpack.c.bf16 %v488_v36, %v486_v35  ;;  %v487_v40 = vld [vmem:[%s3967_s1 + $0x2d0] sm:$0xff]  ;;  %v490_v42 = vld [vmem:[%s3967_s1 + $0x2e8] sm:$0xff]  ;;  %v492_v43 = vld [vmem:[%s3967_s1 + $0x2f8] sm:$0xff]  ;;  %s1993_s17 = sshll.u32 %s3975_s23, 3 }
   0xf   : > { %v2248_v44 = vpack.c.bf16 %v487_v40, %v485_v39  ;;  %v2250_v45 = vpack.c.bf16 %v492_v43, %v490_v42  ;;  %v489_v46 = vld [vmem:[%s3967_s1 + $0x2e0] sm:$0xff]  ;;  %v491_v47 = vld [vmem:[%s3967_s1 + $0x2f0] sm:$0xff]  ;;  %v494_v48 = vld [vmem:[%s3967_s1 + $0x308] sm:$0xff]  ;;  %s3929_s20 = scalar_lea.vmem %s3973_s7, %s1993_s17 }
  0x10   : > { %s2773_s16 = scalar_lea.vmem %s3966_s0, %s2558_s29  ;;  %v496_v49 = vld [vmem:[%s3967_s1 + $0x318] sm:$0xff]  ;;  %v2252_v50 = vpack.c.bf16 %v491_v47, %v489_v46  ;;  %v493_v52 = vld [vmem:[%s3967_s1 + $0x300] sm:$0xff]  ;;  %v495_v53 = vld [vmem:[%s3967_s1 + $0x310] sm:$0xff] }
  0x11   : > { %2233 = vmatpush1.bf16.msra.mxu0 %v2232_v19  ;;  %v288_v41 = vld [vmem:[%s2773_s16 + $0x18] sm:$0xff]  ;;  %v2254_v51 = vpack.c.bf16 %v496_v49, %v494_v48  ;;  %v498_v54 = vld [vmem:[%s3967_s1 + $0x328] sm:$0xff]  ;;  %v2256_v56 = vpack.c.bf16 %v495_v53, %v493_v52  ;;  %v497_v58 = vld [vmem:[%s3967_s1 + $0x320] sm:$0xff] }
  0x12   : > { %2235 = vmatprep.subr.bf16.mxu0 %v2234_v20  ;;  %858 = vmatprep.mubr.f32.mxu0 %v288_v41  ;;  %v500_v55 = vld [vmem:[%s3967_s1 + $0x338] sm:$0xff]  ;;  %v499_v59 = vld [vmem:[%s3967_s1 + $0x330] sm:$0xff]  ;;  %v502_v60 = vld [vmem:[%s3967_s1 + $0x348] sm:$0xff] }
  0x13   : > { %v2258_v57 = vpack.c.bf16 %v500_v55, %v498_v54  ;;  %v504_v61 = vld [vmem:[%s3967_s1 + $0x358] sm:$0xff]  ;;  %v2260_v62 = vpack.c.bf16 %v499_v59, %v497_v58  ;;  %v501_v0 = vld [vmem:[%s3967_s1 + $0x340] sm:$0xff]  ;;  %v503_v1 = vld [vmem:[%s3967_s1 + $0x350] sm:$0xff] }
  0x14   : > { %v2262_v63 = vpack.c.bf16 %v504_v61, %v502_v60  ;;  %v506_v2 = vld [vmem:[%s3967_s1 + $0x368] sm:$0xff]  ;;  %v508_v3 = vld [vmem:[%s3967_s1 + $0x378] sm:$0xff]  ;;  %v2264_v4 = vpack.c.bf16 %v503_v1, %v501_v0  ;;  %v505_v6 = vld [vmem:[%s3967_s1 + $0x360] sm:$0xff] }
  0x15   : > { %2237 = vmatpush1.bf16.msra.mxu0 %v2236_v25  ;;  %v2266_v5 = vpack.c.bf16 %v508_v3, %v506_v2  ;;  %v507_v7 = vld [vmem:[%s3967_s1 + $0x370] sm:$0xff]  ;;  %v510_v8 = vld [vmem:[%s3967_s1 + $0x388] sm:$0xff]  ;;  %v512_v9 = vld [vmem:[%s3967_s1 + $0x398] sm:$0xff] }
  0x16   : > { %2239 = vmatprep.subr.bf16.mxu0 %v2238_v26  ;;  %v2268_v10 = vpack.c.bf16 %v507_v7, %v505_v6  ;;  %v2270_v11 = vpack.c.bf16 %v512_v9, %v510_v8  ;;  %v509_v12 = vld [vmem:[%s3967_s1 + $0x380] sm:$0xff]  ;;  %v511_v13 = vld [vmem:[%s3967_s1 + $0x390] sm:$0xff]  ;;  %v514_v14 = vld [vmem:[%s3967_s1 + $0x3a8] sm:$0xff] }
  0x17   : > { %v516_v15 = vld [vmem:[%s3967_s1 + $0x3b8] sm:$0xff]  ;;  %v2272_v16 = vpack.c.bf16 %v511_v13, %v509_v12  ;;  %v513_v18 = vld [vmem:[%s3967_s1 + $0x3a0] sm:$0xff]  ;;  %v515_v19 = vld [vmem:[%s3967_s1 + $0x3b0] sm:$0xff] }
  0x18   : > { %v2274_v17 = vpack.c.bf16 %v516_v15, %v514_v14  ;;  %v518_v20 = vld [vmem:[%s3967_s1 + $0x3c8] sm:$0xff]  ;;  %v520_v21 = vld [vmem:[%s3967_s1 + $0x3d8] sm:$0xff]  ;;  %v2276_v22 = vpack.c.bf16 %v515_v19, %v513_v18  ;;  %v517_v23 = vld [vmem:[%s3967_s1 + $0x3c0] sm:$0xff] }
  0x19   : > { %2241 = vmatpush1.bf16.msra.mxu0 %v2240_v31  ;;  %v519_v24 = vld [vmem:[%s3967_s1 + $0x3d0] sm:$0xff]  ;;  %v2278_v25 = vpack.c.bf16 %v520_v21, %v518_v20  ;;  %v522_v26 = vld [vmem:[%s3967_s1 + $0x3e8] sm:$0xff]  ;;  %v400_v28 = vld [vmem:[%s3967_s1 + $0x18] sm:$0xff] }
  0x1a   : > { %2243 = vmatprep.subr.bf16.mxu0 %v2242_v32  ;;  %v398_v27 = vld [vmem:[%s3967_s1 + $0x8] sm:$0xff]  ;;  %v524_v29 = vld [vmem:[%s3967_s1 + $0x3f8] sm:$0xff]  ;;  %v397_v31 = vld [vmem:[%s3967_s1] sm:$0xff]  ;;  %v2280_v34 = vpack.c.bf16 %v519_v24, %v517_v23 }
  0x1b   : > { %v2158_v30 = vpack.c.bf16 %v400_v28, %v398_v27  ;;  %v399_v32 = vld [vmem:[%s3967_s1 + $0x10] sm:$0xff]  ;;  %v521_v35 = vld [vmem:[%s3967_s1 + $0x3e0] sm:$0xff]  ;;  %v404_v39 = vld [vmem:[%s3967_s1 + $0x38] sm:$0xff] }
  0x1c   : > { %v2160_v33 = vpack.c.bf16 %v399_v32, %v397_v31  ;;  %v523_v36 = vld [vmem:[%s3967_s1 + $0x3f0] sm:$0xff]  ;;  %v401_v40 = vld [vmem:[%s3967_s1 + $0x20] sm:$0xff]  ;;  %v526_v42 = vld [vmem:[%s3967_s1 + $0x408] sm:$0xff] }
  0x1d   : > { %2245 = vmatpush1.bf16.msra.mxu0 %v2244_v37  ;;  %2159 = vmatprep.subr.bf16.mxu1 %v2158_v30  ;;  %v402_v37 = vld [vmem:[%s3967_s1 + $0x28] sm:$0xff]  ;;  %v403_v41 = vld [vmem:[%s3967_s1 + $0x30] sm:$0xff]  ;;  %v528_v43 = vld [vmem:[%s3967_s1 + $0x418] sm:$0xff] }
  0x1e   : > { %2247 = vmatprep.subr.bf16.mxu0 %v2246_v38  ;;  %v2282_v38 = vpack.c.bf16 %v524_v29, %v522_v26  ;;  %2161 = vmatpush1.bf16.msra.mxu1 %v2160_v33  ;;  %v406_v46 = vld [vmem:[%s3967_s1 + $0x48] sm:$0xff]  ;;  %v408_v47 = vld [vmem:[%s3967_s1 + $0x58] sm:$0xff]  ;;  %v405_v48 = vld [vmem:[%s3967_s1 + $0x40] sm:$0xff]  ;;  %v2286_v53 = vpack.c.bf16 %v528_v43, %v526_v42 }
  0x1f   : > { %v407_v49 = vld [vmem:[%s3967_s1 + $0x50] sm:$0xff]  ;;  %v2166_v52 = vpack.c.bf16 %v408_v47, %v406_v46  ;;  %v530_v55 = vld [vmem:[%s3967_s1 + $0x428] sm:$0xff]  ;;  %v412_v59 = vld [vmem:[%s3967_s1 + $0x78] sm:$0xff] }
  0x20   : > { %v527_v54 = vld [vmem:[%s3967_s1 + $0x410] sm:$0xff]  ;;  %v410_v58 = vld [vmem:[%s3967_s1 + $0x68] sm:$0xff]  ;;  %v409_v60 = vld [vmem:[%s3967_s1 + $0x60] sm:$0xff] }
  0x21   : > { %2249 = vmatpush1.bf16.msra.mxu0 %v2248_v44  ;;  %v2162_v44 = vpack.c.bf16 %v404_v39, %v402_v37  ;;  %v287_v61 = vld [vmem:[%s2773_s16 + $0x10] sm:$0xff]  ;;  %v414_v2 = vld [vmem:[%s3967_s1 + $0x88] sm:$0xff]  ;;  %v416_v3 = vld [vmem:[%s3967_s1 + $0x98] sm:$0xff] }
  0x22   : > { %2251 = vmatprep.subr.bf16.mxu0 %v2250_v45  ;;  %v2164_v45 = vpack.c.bf16 %v403_v41, %v401_v40  ;;  %v295_v1 = vld [vmem:[%s2773_s16 + $0x50] sm:$0xff]  ;;  %v534_v7 = vld [vmem:[%s3967_s1 + $0x448] sm:$0xff]  ;;  %v536_v9 = vld [vmem:[%s3967_s1 + $0x458] sm:$0xff] }
  0x23   : > { %2163 = vmatprep.subr.bf16.mxu1 %v2162_v44  ;;  %v531_v6 = vld [vmem:[%s3967_s1 + $0x430] sm:$0xff]  ;;  %v418_v13 = vld [vmem:[%s3967_s1 + $0xa8] sm:$0xff]  ;;  %v420_v14 = vld [vmem:[%s3967_s1 + $0xb8] sm:$0xff]  ;;  %v2294_v18 = vpack.c.bf16 %v536_v9, %v534_v7 }
  0x24   : > { %2165 = vmatpush1.bf16.msra.mxu1 %v2164_v45  ;;  %v415_v12 = vld [vmem:[%s3967_s1 + $0x90] sm:$0xff]  ;;  %v294_v15 = vld [vmem:[%s2773_s16 + $0x48] sm:$0xff]  ;;  %v533_v19 = vld [vmem:[%s3967_s1 + $0x440] sm:$0xff]  ;;  %v2178_v24 = vpack.c.bf16 %v420_v14, %v418_v13 }
  0x25   : > { %2253 = vmatpush1.bf16.msra.mxu0 %v2252_v50  ;;  %v2284_v50 = vpack.c.bf16 %v523_v36, %v521_v35  ;;  %2167 = vmatprep.subr.bf16.mxu1 %v2166_v52  ;;  %v535_v20 = vld [vmem:[%s3967_s1 + $0x450] sm:$0xff]  ;;  %v538_v21 = vld [vmem:[%s3967_s1 + $0x468] sm:$0xff]  ;;  %v540_v23 = vld [vmem:[%s3967_s1 + $0x478] sm:$0xff] }
  0x26   : > { %2255 = vmatprep.subr.bf16.mxu0 %v2254_v51  ;;  %v525_v51 = vld [vmem:[%s3967_s1 + $0x400] sm:$0xff]  ;;  %v419_v26 = vld [vmem:[%s3967_s1 + $0xb0] sm:$0xff]  ;;  %v422_v27 = vld [vmem:[%s3967_s1 + $0xc8] sm:$0xff]  ;;  %v2296_v30 = vpack.c.bf16 %v535_v20, %v533_v19  ;;  %v2298_v32 = vpack.c.bf16 %v540_v23, %v538_v21 }
  0x27   : > { %v2288_v0 = vpack.c.bf16 %v527_v54, %v525_v51  ;;  %v424_v28 = vld [vmem:[%s3967_s1 + $0xd8] sm:$0xff]  ;;  %v301_v29 = vld [vmem:[%s2773_s16 + $0x80] sm:$0xff]  ;;  %v542_v35 = vld [vmem:[%s3967_s1 + $0x488] sm:$0xff] }
  0x28   : > { %v309_v31 = vld [vmem:[%s2773_s16 + $0xc0] sm:$0xff]  ;;  %v544_v37 = vld [vmem:[%s3967_s1 + $0x498] sm:$0xff]  ;;  %v423_v40 = vld [vmem:[%s3967_s1 + $0xd0] sm:$0xff] }
  0x29   : > { %2257 = vmatpush1.bf16.msra.mxu0 %v2256_v56  ;;  %v532_v56 = vld [vmem:[%s3967_s1 + $0x438] sm:$0xff]  ;;  %v537_v33 = vld [vmem:[%s3967_s1 + $0x460] sm:$0xff]  ;;  %v426_v41 = vld [vmem:[%s3967_s1 + $0xe8] sm:$0xff]  ;;  %v2302_v46 = vpack.c.bf16 %v544_v37, %v542_v35 }
  0x2a   : > { %2259 = vmatprep.subr.bf16.mxu0 %v2258_v57  ;;  %v2168_v57 = vpack.c.bf16 %v407_v49, %v405_v48  ;;  %v421_v39 = vld [vmem:[%s3967_s1 + $0xc0] sm:$0xff]  ;;  %v428_v42 = vld [vmem:[%s3967_s1 + $0xf8] sm:$0xff]  ;;  %v543_v48 = vld [vmem:[%s3967_s1 + $0x490] sm:$0xff] }
  0x2b   : > { %v308_v43 = vld [vmem:[%s2773_s16 + $0xb8] sm:$0xff]  ;;  %v541_v47 = vld [vmem:[%s3967_s1 + $0x480] sm:$0xff]  ;;  %v546_v49 = vld [vmem:[%s3967_s1 + $0x4a8] sm:$0xff]  ;;  %v2186_v52 = vpack.c.bf16 %v428_v42, %v426_v41 }
  0x2c   : > { %2169 = vmatpush1.bf16.msra.mxu1 %v2168_v57  ;;  %v316_v45 = vld [vmem:[%s2773_s16 + $0xf8] sm:$0xff]  ;;  %v427_v54 = vld [vmem:[%s3967_s1 + $0xf0] sm:$0xff]  ;;  %v322_v7 = vld [vmem:[%s2773_s16 + $0x128] sm:$0xff] }
  0x2d   : > { %2261 = vmatpush1.bf16.msra.mxu0 %v2260_v62  ;;  %v2170_v62 = vpack.c.bf16 %v412_v59, %v410_v58  ;;  %v548_v51 = vld [vmem:[%s3967_s1 + $0x4b8] sm:$0xff]  ;;  %v315_v57 = vld [vmem:[%s2773_s16 + $0xf0] sm:$0xff]  ;;  %v2304_v58 = vpack.c.bf16 %v543_v48, %v541_v47  ;;  %v330_v9 = vld [vmem:[%s2773_s16 + $0x168] sm:$0xff] }
  0x2e   : > { %2263 = vmatprep.subr.bf16.mxu0 %v2262_v63  ;;  %v411_v63 = vld [vmem:[%s3967_s1 + $0x70] sm:$0xff]  ;;  %v554_v13 = vld [vmem:[%s3967_s1 + $0x4e8] sm:$0xff]  ;;  %v440_v20 = vld [vmem:[%s3967_s1 + $0x158] sm:$0xff] }
  0x2f   : > { %v2172_v8 = vpack.c.bf16 %v411_v63, %v409_v60  ;;  %2171 = vmatprep.subr.bf16.mxu1 %v2170_v62  ;;  %v323_v59 = vld [vmem:[%s2773_s16 + $0x130] sm:$0xff]  ;;  %v2306_v60 = vpack.c.bf16 %v548_v51, %v546_v49  ;;  %v550_v63 = vld [vmem:[%s3967_s1 + $0x4c8] sm:$0xff]  ;;  %v329_v21 = vld [vmem:[%s2773_s16 + $0x160] sm:$0xff] }
  0x30   : > { %v547_v62 = vld [vmem:[%s3967_s1 + $0x4b0] sm:$0xff]  ;;  %v438_v19 = vld [vmem:[%s3967_s1 + $0x148] sm:$0xff]  ;;  %v337_v23 = vld [vmem:[%s2773_s16 + $0x1a0] sm:$0xff] }
  0x31   : > { %2265 = vmatpush1.bf16.msra.mxu0 %v2264_v4  ;;  %v2290_v4 = vpack.c.bf16 %v532_v56, %v530_v55  ;;  %2173 = vmatpush1.bf16.msra.mxu1 %v2172_v8  ;;  %v430_v55 = vld [vmem:[%s3967_s1 + $0x108] sm:$0xff]  ;;  %v432_v56 = vld [vmem:[%s3967_s1 + $0x118] sm:$0xff]  ;;  %v343_v49 = vld [vmem:[%s2773_s16 + $0x1d0] sm:$0xff] }
  0x32   : > { %2267 = vmatprep.subr.bf16.mxu0 %v2266_v5  ;;  %v529_v5 = vld [vmem:[%s3967_s1 + $0x420] sm:$0xff]  ;;  %v336_v35 = vld [vmem:[%s2773_s16 + $0x198] sm:$0xff]  ;;  %v562_v41 = vld [vmem:[%s3967_s1 + $0x528] sm:$0xff] }
  0x33   : > { %v344_v37 = vld [vmem:[%s2773_s16 + $0x1d8] sm:$0xff]  ;;  %v446_v47 = vld [vmem:[%s3967_s1 + $0x188] sm:$0xff]  ;;  %v351_v51 = vld [vmem:[%s2773_s16 + $0x210] sm:$0xff] }
  0x34   : > { %v448_v48 = vld [vmem:[%s3967_s1 + $0x198] sm:$0xff] }
  0x35   : > { %2269 = vmatpush1.bf16.msra.mxu0 %v2268_v10  ;;  %v2174_v10 = vpack.c.bf16 %v416_v3, %v414_v2  ;;  %v2190_v2 = vpack.c.bf16 %v432_v56, %v430_v55  ;;  %v429_v3 = vld [vmem:[%s3967_s1 + $0x100] sm:$0xff]  ;;  %v563_v55 = vld [vmem:[%s3967_s1 + $0x530] sm:$0xff]  ;;  %v566_v56 = vld [vmem:[%s3967_s1 + $0x548] sm:$0xff] }
  0x36   : > { %2271 = vmatprep.subr.bf16.mxu0 %v2270_v11  ;;  %v413_v11 = vld [vmem:[%s3967_s1 + $0x80] sm:$0xff] }
  0x37   : > { %2175 = vmatprep.subr.bf16.mxu1 %v2174_v10 }
  0x39   : > { %2273 = vmatpush1.bf16.msra.mxu0 %v2272_v16  ;;  %v2292_v16 = vpack.c.bf16 %v531_v6, %v529_v5  ;;  %v434_v5 = vld [vmem:[%s3967_s1 + $0x128] sm:$0xff]  ;;  %v436_v6 = vld [vmem:[%s3967_s1 + $0x138] sm:$0xff] }
  0x3a   : > { %2275 = vmatprep.subr.bf16.mxu0 %v2274_v17  ;;  %v302_v17 = vld [vmem:[%s2773_s16 + $0x88] sm:$0xff] }
  0x3d   : > { %2277 = vmatpush1.bf16.msra.mxu0 %v2276_v22  ;;  %v2176_v22 = vpack.c.bf16 %v415_v12, %v413_v11  ;;  %v549_v11 = vld [vmem:[%s3967_s1 + $0x4c0] sm:$0xff]  ;;  %v551_v12 = vld [vmem:[%s3967_s1 + $0x4d0] sm:$0xff] }
  0x3e   : > { %2279 = vmatprep.subr.bf16.mxu0 %v2278_v25  ;;  %v417_v25 = vld [vmem:[%s3967_s1 + $0xa0] sm:$0xff] }
  0x3f   : > { %2177 = vmatpush1.bf16.msra.mxu1 %v2176_v22  ;;  %v2180_v36 = vpack.c.bf16 %v419_v26, %v417_v25  ;;  %v2312_v22 = vpack.c.bf16 %v551_v12, %v549_v11  ;;  %v553_v25 = vld [vmem:[%s3967_s1 + $0x4e0] sm:$0xff]  ;;  %v555_v26 = vld [vmem:[%s3967_s1 + $0x4f0] sm:$0xff]  ;;  %v454_v12 = vld [vmem:[%s3967_s1 + $0x1c8] sm:$0xff] }
  0x40   : > { %2179 = vmatprep.subr.bf16.mxu1 %v2178_v24  ;;  %v451_v11 = vld [vmem:[%s3967_s1 + $0x1b0] sm:$0xff] }
  0x41   : > { %2281 = vmatpush1.bf16.msra.mxu0 %v2280_v34  ;;  %v539_v34 = vld [vmem:[%s3967_s1 + $0x470] sm:$0xff] }
  0x42   : > { %2283 = vmatprep.subr.bf16.mxu0 %v2282_v38  ;;  %v2182_v38 = vpack.c.bf16 %v424_v28, %v422_v27  ;;  %v2300_v44 = vpack.c.bf16 %v539_v34, %v537_v33  ;;  %v558_v27 = vld [vmem:[%s3967_s1 + $0x508] sm:$0xff]  ;;  %v444_v34 = vld [vmem:[%s3967_s1 + $0x178] sm:$0xff] }
  0x43   : > { %2181 = vmatpush1.bf16.msra.mxu1 %v2180_v36  ;;  %v442_v33 = vld [vmem:[%s3967_s1 + $0x168] sm:$0xff]  ;;  %v2316_v36 = vpack.c.bf16 %v555_v26, %v553_v25  ;;  %v455_v25 = vld [vmem:[%s3967_s1 + $0x1d0] sm:$0xff] }
  0x44   : > { %2183 = vmatprep.subr.bf16.mxu1 %v2182_v38  ;;  %v458_v26 = vld [vmem:[%s3967_s1 + $0x1e8] sm:$0xff] }
  0x45   : > { %2285 = vmatpush1.bf16.msra.mxu0 %v2284_v50  ;;  %v2184_v50 = vpack.c.bf16 %v423_v40, %v421_v39  ;;  %v557_v39 = vld [vmem:[%s3967_s1 + $0x500] sm:$0xff]  ;;  %v559_v40 = vld [vmem:[%s3967_s1 + $0x510] sm:$0xff] }
  0x46   : > { %2287 = vmatprep.subr.bf16.mxu0 %v2286_v53  ;;  %v425_v53 = vld [vmem:[%s3967_s1 + $0xe0] sm:$0xff] }
  0x47   : > { %2185 = vmatpush1.bf16.msra.mxu1 %v2184_v50  ;;  %v2320_v50 = vpack.c.bf16 %v559_v40, %v557_v39  ;;  %v459_v39 = vld [vmem:[%s3967_s1 + $0x1f0] sm:$0xff] }
  0x48   : > { %859 = vmatmul.mubr.f32.vlgmr.msra.gmra.mrb[0].mxu0 %v287_v61  ;;  %v545_v61 = vld [vmem:[%s3967_s1 + $0x4a0] sm:$0xff]  ;;  %2187 = vmatprep.subr.bf16.mxu1 %v2186_v52  ;;  %v286_v52 = vld [vmem:[%s2773_s16 + $0x8] sm:$0xff]  ;;  %v371_v40 = vld [vmem:[%s2773_s16 + $0x2b0] sm:$0xff] }
  0x49   : > { %2289 = vmatpush1.bf16.msra.mxu0 %v2288_v0  ;;  %864 = vmatprep.mubr.f32.mxu0 %v295_v1  ;;  %v2188_v0 = vpack.c.bf16 %v427_v54, %v425_v53  ;;  %v552_v1 = vld [vmem:[%s3967_s1 + $0x4d8] sm:$0xff]  ;;  %v2308_v8 = vpack.c.bf16 %v547_v62, %v545_v61  ;;  %v561_v54 = vld [vmem:[%s3967_s1 + $0x520] sm:$0xff]  ;;  %v447_v61 = vld [vmem:[%s3967_s1 + $0x190] sm:$0xff] }
  0x4a   : > { %2291 = vmatprep.subr.bf16.mxu0 %v2290_v4  ;;  %v431_v4 = vld [vmem:[%s3967_s1 + $0x110] sm:$0xff]  ;;  %v2310_v10 = vpack.c.bf16 %v552_v1, %v550_v63  ;;  %697 = vmatprep.mubr.f32.mxu1 %v286_v52  ;;  %v450_v62 = vld [vmem:[%s3967_s1 + $0x1a8] sm:$0xff]  ;;  %v452_v63 = vld [vmem:[%s3967_s1 + $0x1b8] sm:$0xff]  ;;  %v2324_v1 = vpack.c.bf16 %v563_v55, %v561_v54 }
  0x4b   : > { %2189 = vmatpush1.bf16.msra.mxu1 %v2188_v0  ;;  %v2192_v14 = vpack.c.bf16 %v431_v4, %v429_v3  ;;  %v350_v0 = vld [vmem:[%s2773_s16 + $0x208] sm:$0xff]  ;;  %v565_v4 = vld [vmem:[%s3967_s1 + $0x540] sm:$0xff]  ;;  %v583_v54 = vld [vmem:[%s3967_s1 + $0x5d0] sm:$0xff] }
  0x4c   : > { %865 = vmatmul.mubr.f32.gmra.mrb[2].mxu0 %v294_v15  ;;  %v556_v15 = vld [vmem:[%s3967_s1 + $0x4f8] sm:$0xff]  ;;  %2191 = vmatprep.subr.bf16.mxu1 %v2190_v2  ;;  %v358_v2 = vld [vmem:[%s2773_s16 + $0x248] sm:$0xff] }
  0x4d   : > { %2293 = vmatpush1.bf16.msra.mxu0 %v2292_v16  ;;  %870 = vmatprep.mubr.f32.mxu0 %v302_v17  ;;  %v2194_v16 = vpack.c.bf16 %v436_v6, %v434_v5  ;;  %v433_v17 = vld [vmem:[%s3967_s1 + $0x120] sm:$0xff]  ;;  %v2314_v24 = vpack.c.bf16 %v556_v15, %v554_v13  ;;  %v567_v5 = vld [vmem:[%s3967_s1 + $0x550] sm:$0xff]  ;;  %v570_v6 = vld [vmem:[%s3967_s1 + $0x568] sm:$0xff] }
  0x4e   : > { %2295 = vmatprep.subr.bf16.mxu0 %v2294_v18  ;;  %v435_v18 = vld [vmem:[%s3967_s1 + $0x130] sm:$0xff]  ;;  %v456_v13 = vld [vmem:[%s3967_s1 + $0x1d8] sm:$0xff]  ;;  %v2328_v15 = vpack.c.bf16 %v567_v5, %v565_v4  ;;  %v586_v55 = vld [vmem:[%s3967_s1 + $0x5e8] sm:$0xff] }
  0x4f   : > { %2193 = vmatpush1.bf16.msra.mxu1 %v2192_v14  ;;  %v2196_v28 = vpack.c.bf16 %v435_v18, %v433_v17  ;;  %v357_v14 = vld [vmem:[%s2773_s16 + $0x240] sm:$0xff]  ;;  %v300_v4 = vld [vmem:[%s2773_s16 + $0x78] sm:$0xff] }
  0x50   : > { %871 = vmatmul.mubr.f32.gmra.mrb[4].mxu0 %v301_v29  ;;  %v560_v29 = vld [vmem:[%s3967_s1 + $0x518] sm:$0xff]  ;;  %2195 = vmatprep.subr.bf16.mxu1 %v2194_v16  ;;  %v365_v16 = vld [vmem:[%s2773_s16 + $0x280] sm:$0xff] }
  0x51   : > { %2297 = vmatpush1.bf16.msra.mxu0 %v2296_v30  ;;  %876 = vmatprep.mubr.f32.mxu0 %v309_v31  ;;  %v2198_v30 = vpack.c.bf16 %v440_v20, %v438_v19  ;;  %v437_v31 = vld [vmem:[%s3967_s1 + $0x140] sm:$0xff]  ;;  %v2318_v38 = vpack.c.bf16 %v560_v29, %v558_v27  ;;  %v571_v19 = vld [vmem:[%s3967_s1 + $0x570] sm:$0xff]  ;;  %v574_v20 = vld [vmem:[%s3967_s1 + $0x588] sm:$0xff] }
  0x52   : > { %2299 = vmatprep.subr.bf16.mxu0 %v2298_v32  ;;  %v439_v32 = vld [vmem:[%s3967_s1 + $0x150] sm:$0xff]  ;;  %v569_v18 = vld [vmem:[%s3967_s1 + $0x560] sm:$0xff]  ;;  %v460_v27 = vld [vmem:[%s3967_s1 + $0x1f8] sm:$0xff] }
  0x53   : > { %2197 = vmatpush1.bf16.msra.mxu1 %v2196_v28  ;;  %v2200_v42 = vpack.c.bf16 %v439_v32, %v437_v31  ;;  %v364_v28 = vld [vmem:[%s2773_s16 + $0x278] sm:$0xff]  ;;  %v2332_v29 = vpack.c.bf16 %v571_v19, %v569_v18  ;;  %v573_v32 = vld [vmem:[%s3967_s1 + $0x580] sm:$0xff]  ;;  %v1326_v19 = vld [vmem:[%s3969_s3 + $0x88] sm:$0xff] }
  0x54   : > { %877 = vmatmul.mubr.f32.gmra.mrb[6].mxu0 %v308_v43  ;;  %v564_v43 = vld [vmem:[%s3967_s1 + $0x538] sm:$0xff]  ;;  %2199 = vmatprep.subr.bf16.mxu1 %v2198_v30  ;;  %v1325_v18 = vld [vmem:[%s3969_s3 + $0x80] sm:$0xff] }
  0x55   : > { %2301 = vmatpush1.bf16.msra.mxu0 %v2300_v44  ;;  %882 = vmatprep.mubr.f32.mxu0 %v316_v45  ;;  %v2202_v44 = vpack.c.bf16 %v444_v34, %v442_v33  ;;  %v441_v45 = vld [vmem:[%s3967_s1 + $0x160] sm:$0xff]  ;;  %v2322_v53 = vpack.c.bf16 %v564_v43, %v562_v41  ;;  %v372_v30 = vld [vmem:[%s2773_s16 + $0x2b8] sm:$0xff]  ;;  %v575_v33 = vld [vmem:[%s3967_s1 + $0x590] sm:$0xff] }
  0x56   : > { %2303 = vmatprep.subr.bf16.mxu0 %v2302_v46  ;;  %v443_v46 = vld [vmem:[%s3967_s1 + $0x170] sm:$0xff]  ;;  %v578_v34 = vld [vmem:[%s3967_s1 + $0x5a8] sm:$0xff]  ;;  %v2336_v41 = vpack.c.bf16 %v575_v33, %v573_v32  ;;  %v392_v5 = vld [vmem:[%s2773_s16 + $0x358] sm:$0xff] }
  0x57   : > { %2201 = vmatpush1.bf16.msra.mxu1 %v2200_v42  ;;  %v379_v42 = vld [vmem:[%s2773_s16 + $0x2f0] sm:$0xff]  ;;  %v600_v32 = vld [vmem:[%s3967_s1 + $0x658] sm:$0xff]  ;;  %v306_v33 = vld [vmem:[%s2773_s16 + $0xa8] sm:$0xff] }
  0x58   : > { %883 = vmatmul.mubr.f32.gmra.mrb[8].mxu0 %v315_v57  ;;  %v2204_v57 = vpack.c.bf16 %v443_v46, %v441_v45  ;;  %2203 = vmatprep.subr.bf16.mxu1 %v2202_v44  ;;  %v577_v44 = vld [vmem:[%s3967_s1 + $0x5a0] sm:$0xff]  ;;  %v579_v45 = vld [vmem:[%s3967_s1 + $0x5b0] sm:$0xff] }
  0x59   : > { %2305 = vmatpush1.bf16.msra.mxu0 %v2304_v58  ;;  %888 = vmatprep.mubr.f32.mxu0 %v323_v59  ;;  %v568_v58 = vld [vmem:[%s3967_s1 + $0x558] sm:$0xff]  ;;  %v2206_v59 = vpack.c.bf16 %v448_v48, %v446_v47  ;;  %v582_v47 = vld [vmem:[%s3967_s1 + $0x5c8] sm:$0xff] }
  0x5a   : > { %2307 = vmatprep.subr.bf16.mxu0 %v2306_v60  ;;  %v445_v60 = vld [vmem:[%s3967_s1 + $0x180] sm:$0xff]  ;;  %v2326_v3 = vpack.c.bf16 %v568_v58, %v566_v56  ;;  %v584_v48 = vld [vmem:[%s3967_s1 + $0x5d8] sm:$0xff] }
  0x5b   : > { %2205 = vmatpush1.bf16.msra.mxu1 %v2204_v57  ;;  %v2342_v52 = vpack.c.bf16 %v584_v48, %v582_v47  ;;  %v588_v56 = vld [vmem:[%s3967_s1 + $0x5f8] sm:$0xff]  ;;  %v285_v57 = vld [vmem:[%s2773_s16] sm:$0xff]  ;;  %v602_v47 = vld [vmem:[%s3967_s1 + $0x668] sm:$0xff] }
  0x5c   : > { %889 = vmatmul.mubr.f32.gmra.mrb[10].mxu0 %v322_v7  ;;  %v2208_v7 = vpack.c.bf16 %v447_v61, %v445_v60  ;;  %2207 = vmatprep.subr.bf16.mxu1 %v2206_v59  ;;  %v293_v58 = vld [vmem:[%s2773_s16 + $0x40] sm:$0xff]  ;;  %v604_v48 = vld [vmem:[%s3967_s1 + $0x678] sm:$0xff] }
  0x5d   : > { %2309 = vmatpush1.bf16.msra.mxu0 %v2308_v8  ;;  %894 = vmatprep.mubr.f32.mxu0 %v330_v9  ;;  %v572_v8 = vld [vmem:[%s3967_s1 + $0x578] sm:$0xff]  ;;  %v2210_v9 = vpack.c.bf16 %v452_v63, %v450_v62  ;;  %v385_v59 = vld [vmem:[%s2773_s16 + $0x320] sm:$0xff]  ;;  %v2346_v62 = vpack.c.bf16 %v588_v56, %v586_v55  ;;  %v303_v55 = vld [vmem:[%s2773_s16 + $0x90] sm:$0xff] }
  0x5e   : > { %2311 = vmatprep.subr.bf16.mxu0 %v2310_v10  ;;  %v449_v10 = vld [vmem:[%s3967_s1 + $0x1a0] sm:$0xff]  ;;  %v2330_v17 = vpack.c.bf16 %v572_v8, %v570_v6 }
  0x5f   : > { %2209 = vmatpush1.bf16.msra.mxu1 %v2208_v7  ;;  %v393_v61 = vld [vmem:[%s2773_s16 + $0x360] sm:$0xff]  ;;  %v290_v7 = vld [vmem:[%s2773_s16 + $0x28] sm:$0xff] }
  0x60   : > { %895 = vmatmul.mubr.f32.gmra.mrb[12].mxu0 %v329_v21  ;;  %v2212_v21 = vpack.c.bf16 %v451_v11, %v449_v10  ;;  %2211 = vmatprep.subr.bf16.mxu1 %v2210_v9  ;;  %v585_v63 = vld [vmem:[%s3967_s1 + $0x5e0] sm:$0xff]  ;;  %v591_v10 = vld [vmem:[%s3967_s1 + $0x610] sm:$0xff]  ;;  %v594_v11 = vld [vmem:[%s3967_s1 + $0x628] sm:$0xff] }
  0x61   : > { %2313 = vmatpush1.bf16.msra.mxu0 %v2312_v22  ;;  %900 = vmatprep.mubr.f32.mxu0 %v337_v23  ;;  %v576_v22 = vld [vmem:[%s3967_s1 + $0x598] sm:$0xff]  ;;  %v2214_v23 = vpack.c.bf16 %v456_v13, %v454_v12  ;;  %v589_v9 = vld [vmem:[%s3967_s1 + $0x600] sm:$0xff] }
  0x62   : > { %2315 = vmatprep.subr.bf16.mxu0 %v2314_v24  ;;  %v453_v24 = vld [vmem:[%s3967_s1 + $0x1c0] sm:$0xff]  ;;  %v2334_v31 = vpack.c.bf16 %v576_v22, %v574_v20  ;;  %v596_v13 = vld [vmem:[%s3967_s1 + $0x638] sm:$0xff]  ;;  %v2382_v22 = vpack.c.bf16 %v1326_v19, %v1325_v18  ;;  %v335_v19 = vld [vmem:[%s2773_s16 + $0x190] sm:$0xff] }
  0x63   : > { %2213 = vmatpush1.bf16.msra.mxu1 %v2212_v21  ;;  %v289_v12 = vld [vmem:[%s2773_s16 + $0x20] sm:$0xff]  ;;  %v2352_v21 = vpack.c.bf16 %v591_v10, %v589_v9  ;;  %v1318_v10 = vld [vmem:[%s3969_s3 + $0x48] sm:$0xff] }
  0x64   : > { %901 = vmatmul.mubr.f32.gmra.mrb[14].mxu0 %v336_v35  ;;  %v2216_v35 = vpack.c.bf16 %v455_v25, %v453_v24  ;;  %2215 = vmatprep.subr.bf16.mxu1 %v2214_v23  ;;  %v1309_v20 = vld [vmem:[%s3969_s3] sm:$0xff]  ;;  %v1310_v23 = vld [vmem:[%s3969_s3 + $0x8] sm:$0xff]  ;;  %v1327_v24 = vld [vmem:[%s3969_s3 + $0x90] sm:$0xff] }
  0x65   : > { %2317 = vmatpush1.bf16.msra.mxu0 %v2316_v36  ;;  %906 = vmatprep.mubr.f32.mxu0 %v344_v37  ;;  %v580_v36 = vld [vmem:[%s3967_s1 + $0x5b8] sm:$0xff]  ;;  %v2218_v37 = vpack.c.bf16 %v460_v27, %v458_v26  ;;  %v2354_v26 = vpack.c.bf16 %v596_v13, %v594_v11  ;;  %v595_v27 = vld [vmem:[%s3967_s1 + $0x630] sm:$0xff]  ;;  %v1317_v9 = vld [vmem:[%s3969_s3 + $0x40] sm:$0xff] }
  0x66   : > { %2319 = vmatprep.subr.bf16.mxu0 %v2318_v38  ;;  %v457_v38 = vld [vmem:[%s3967_s1 + $0x1e0] sm:$0xff]  ;;  %v2338_v43 = vpack.c.bf16 %v580_v36, %v578_v34  ;;  %v1328_v25 = vld [vmem:[%s3969_s3 + $0x98] sm:$0xff]  ;;  %v318_v11 = vld [vmem:[%s2773_s16 + $0x108] sm:$0xff] }
  0x67   : > { %2217 = vmatpush1.bf16.msra.mxu1 %v2216_v35  ;;  %v2220_v46 = vpack.c.bf16 %v459_v39, %v457_v38  ;;  %v2386_v34 = vpack.c.bf16 %v1328_v25, %v1327_v24  ;;  %v314_v35 = vld [vmem:[%s2773_s16 + $0xe8] sm:$0xff]  ;;  %v296_v39 = vld [vmem:[%s2773_s16 + $0x58] sm:$0xff]  ;;  %v605_v13 = vld [vmem:[%s3967_s1 + $0x680] sm:$0xff] }
  0x68   : > { %907 = vmatmul.mubr.f32.gmra.mrb[16].mxu0 %v343_v49  ;;  %2219 = vmatprep.subr.bf16.mxu1 %v2218_v37  ;;  %v378_v49 = vld [vmem:[%s2773_s16 + $0x2e8] sm:$0xff]  ;;  %v1329_v37 = vld [vmem:[%s3969_s3 + $0xa0] sm:$0xff]  ;;  %v1319_v25 = vld [vmem:[%s3969_s3 + $0x50] sm:$0xff] }
  0x69   : > { %2321 = vmatpush1.bf16.msra.mxu0 %v2320_v50  ;;  %912 = vmatprep.mubr.f32.mxu0 %v351_v51  ;;  %v2340_v50 = vpack.c.bf16 %v579_v45, %v577_v44  ;;  %v386_v51 = vld [vmem:[%s2773_s16 + $0x328] sm:$0xff]  ;;  %v597_v45 = vld [vmem:[%s3967_s1 + $0x640] sm:$0xff] }
  0x6a   : > { %2323 = vmatprep.subr.bf16.mxu0 %v2322_v53  ;;  %v581_v53 = vld [vmem:[%s3967_s1 + $0x5c0] sm:$0xff]  ;;  %v1330_v38 = vld [vmem:[%s3969_s3 + $0xa8] sm:$0xff] }
  0x6b   : > { %2221 = vmatpush1.bf16.msra.mxu1 %v2220_v46  ;;  %v2344_v60 = vpack.c.bf16 %v583_v54, %v581_v53  ;;  %v599_v46 = vld [vmem:[%s3967_s1 + $0x650] sm:$0xff]  ;;  %v1332_v54 = vld [vmem:[%s3969_s3 + $0xb8] sm:$0xff] }
  0x6c   : > { %913 = vmatmul.mubr.f32.gmra.mrb[18].mxu0 %v350_v0  ;;  %v587_v0 = vld [vmem:[%s3967_s1 + $0x5f0] sm:$0xff]  ;;  %2383 = vmatprep.subr.bf16.mxu1 %v2382_v22  ;;  %v2360_v56 = vpack.c.bf16 %v599_v46, %v597_v45  ;;  %v1336_v22 = vld [vmem:[%s3969_s3 + $0xd8] sm:$0xff]  ;;  %v613_v45 = vld [vmem:[%s3967_s1 + $0x6c0] sm:$0xff] }
  0x6d   : > { %2325 = vmatpush1.bf16.msra.mxu0 %v2324_v1  ;;  %918 = vmatprep.mubr.f32.mxu0 %v358_v2  ;;  %v590_v1 = vld [vmem:[%s3967_s1 + $0x608] sm:$0xff]  ;;  %v592_v2 = vld [vmem:[%s3967_s1 + $0x618] sm:$0xff]  ;;  %v2348_v6 = vpack.c.bf16 %v587_v0, %v585_v63  ;;  %v1331_v53 = vld [vmem:[%s3969_s3 + $0xb0] sm:$0xff] }
  0x6e   : > { %2327 = vmatprep.subr.bf16.mxu0 %v2326_v3  ;;  %698 = vmatmul.mubr.f32.vlgmr.msra.gmra.mrb[0].mxu1 %v285_v57  ;;  %v292_v3 = vld [vmem:[%s2773_s16 + $0x38] sm:$0xff]  ;;  %v2350_v8 = vpack.c.bf16 %v592_v2, %v590_v1  ;;  %v1315_v57 = vld [vmem:[%s3969_s3 + $0x30] sm:$0xff]  ;;  %v606_v63 = vld [vmem:[%s3967_s1 + $0x688] sm:$0xff]  ;;  %v2394_v2 = vpack.c.bf16 %v1332_v54, %v1331_v53 }
  0x6f   : > { %703 = vmatprep.mubr.f32.mxu1 %v293_v58  ;;  %v1316_v58 = vld [vmem:[%s3969_s3 + $0x38] sm:$0xff]  ;;  %v615_v46 = vld [vmem:[%s3967_s1 + $0x6d0] sm:$0xff] }
  0x70   : > { %919 = vmatmul.mubr.f32.gmra.mrb[20].mxu0 %v357_v14  ;;  %v299_v14 = vld [vmem:[%s2773_s16 + $0x70] sm:$0xff]  ;;  %v608_v0 = vld [vmem:[%s3967_s1 + $0x698] sm:$0xff]  ;;  %v2376_v54 = vpack.c.bf16 %v615_v46, %v613_v45 }
  0x71   : > { %2329 = vmatpush1.bf16.msra.mxu0 %v2328_v15  ;;  %924 = vmatprep.mubr.f32.mxu0 %v365_v16  ;;  %v307_v15 = vld [vmem:[%s2773_s16 + $0xb0] sm:$0xff]  ;;  %v297_v16 = vld [vmem:[%s2773_s16 + $0x60] sm:$0xff]  ;;  %v320_v1 = vld [vmem:[%s2773_s16 + $0x118] sm:$0xff] }
  0x72   : > { %2331 = vmatprep.subr.bf16.mxu0 %v2330_v17  ;;  %704 = vmatmul.mubr.f32.gmra.mrb[2].mxu1 %v292_v3  ;;  %v593_v17 = vld [vmem:[%s3967_s1 + $0x620] sm:$0xff]  ;;  %v328_v3 = vld [vmem:[%s2773_s16 + $0x158] sm:$0xff]  ;;  %v331_v53 = vld [vmem:[%s2773_s16 + $0x170] sm:$0xff] }
  0x73   : > { %709 = vmatprep.mubr.f32.mxu1 %v300_v4  ;;  %v2396_v4 = vpack.c.bf16 %v1316_v58, %v1315_v57  ;;  %v617_v57 = vld [vmem:[%s3967_s1 + $0x6e0] sm:$0xff]  ;;  %v619_v58 = vld [vmem:[%s3967_s1 + $0x6f0] sm:$0xff]  ;;  %v396_v45 = vld [vmem:[%s2773_s16 + $0x378] sm:$0xff] }
  0x74   : > { %925 = vmatmul.mubr.f32.gmra.mrb[22].mxu0 %v364_v28  ;;  %v2384_v28 = vpack.c.bf16 %v1310_v23, %v1309_v20  ;;  %v2400_v20 = vpack.c.bf16 %v1318_v10, %v1317_v9  ;;  %v317_v23 = vld [vmem:[%s2773_s16 + $0x100] sm:$0xff]  ;;  %v359_v10 = vld [vmem:[%s2773_s16 + $0x250] sm:$0xff] }
  0x75   : > { %2333 = vmatpush1.bf16.msra.mxu0 %v2332_v29  ;;  %930 = vmatprep.mubr.f32.mxu0 %v372_v30  ;;  %v1311_v29 = vld [vmem:[%s3969_s3 + $0x10] sm:$0xff]  ;;  %v1312_v30 = vld [vmem:[%s3969_s3 + $0x18] sm:$0xff]  ;;  %v377_v9 = vld [vmem:[%s2773_s16 + $0x2e0] sm:$0xff] }
  0x76   : > { %2335 = vmatprep.subr.bf16.mxu0 %v2334_v31  ;;  %710 = vmatmul.mubr.f32.gmra.mrb[4].mxu1 %v299_v14  ;;  %v598_v31 = vld [vmem:[%s3967_s1 + $0x648] sm:$0xff]  ;;  %v2388_v36 = vpack.c.bf16 %v1312_v30, %v1311_v29  ;;  %v607_v14 = vld [vmem:[%s3967_s1 + $0x690] sm:$0xff]  ;;  %v609_v29 = vld [vmem:[%s3967_s1 + $0x6a0] sm:$0xff] }
  0x77   : > { %715 = vmatprep.mubr.f32.mxu1 %v307_v15  ;;  %2385 = vmatpush3.bf16.msra.mxu1 %v2384_v28  ;;  %v2358_v44 = vpack.c.bf16 %v600_v32, %v598_v31  ;;  %v610_v15 = vld [vmem:[%s3967_s1 + $0x6a8] sm:$0xff]  ;;  %v2368_v24 = vpack.c.bf16 %v607_v14, %v605_v13  ;;  %v611_v30 = vld [vmem:[%s3967_s1 + $0x6b0] sm:$0xff]  ;;  %v616_v32 = vld [vmem:[%s3967_s1 + $0x6d8] sm:$0xff] }
  0x78   : > { %931 = vmatmul.mubr.f32.gmra.mrb[24].mxu0 %v371_v40  ;;  %v2356_v40 = vpack.c.bf16 %v595_v27, %v593_v17  ;;  %2387 = vmatprep.subr.bf16.mxu1 %v2386_v34  ;;  %v327_v17 = vld [vmem:[%s2773_s16 + $0x150] sm:$0xff]  ;;  %v325_v27 = vld [vmem:[%s2773_s16 + $0x140] sm:$0xff]  ;;  %v614_v31 = vld [vmem:[%s3967_s1 + $0x6c8] sm:$0xff] }
  0x79   : > { %2337 = vmatpush1.bf16.msra.mxu0 %v2336_v41  ;;  %936 = vmatprep.mubr.f32.mxu0 %v379_v42  ;;  %v1313_v41 = vld [vmem:[%s3969_s3 + $0x20] sm:$0xff]  ;;  %v1314_v42 = vld [vmem:[%s3969_s3 + $0x28] sm:$0xff]  ;;  %v384_v13 = vld [vmem:[%s2773_s16 + $0x318] sm:$0xff] }
  0x7a   : > { %2339 = vmatprep.subr.bf16.mxu0 %v2338_v43  ;;  %v304_v43 = vld [vmem:[%s2773_s16 + $0x98] sm:$0xff]  ;;  %716 = vmatmul.mubr.f32.gmra.mrb[6].mxu1 %v306_v33  ;;  %v334_v33 = vld [vmem:[%s2773_s16 + $0x188] sm:$0xff]  ;;  %v1323_v46 = vld [vmem:[%s3969_s3 + $0x70] sm:$0xff] }
  0x7b   : > { %721 = vmatprep.mubr.f32.mxu1 %v314_v35  ;;  %2389 = vmatpush3.bf16.msra.mxu1 %v2388_v36  ;;  %v342_v35 = vld [vmem:[%s2773_s16 + $0x1c8] sm:$0xff] }
  0x7c   : > { %937 = vmatmul.mubr.f32.gmra.mrb[26].mxu0 %v378_v49  ;;  %v313_v49 = vld [vmem:[%s2773_s16 + $0xe0] sm:$0xff]  ;;  %v366_v14 = vld [vmem:[%s2773_s16 + $0x288] sm:$0xff] }
  0x7d   : > { %2341 = vmatpush1.bf16.msra.mxu0 %v2340_v50  ;;  %942 = vmatprep.mubr.f32.mxu0 %v386_v51  ;;  %v2390_v50 = vpack.c.bf16 %v1330_v38, %v1329_v37  ;;  %v321_v51 = vld [vmem:[%s2773_s16 + $0x120] sm:$0xff]  ;;  %v1338_v38 = vld [vmem:[%s3969_s3 + $0xe8] sm:$0xff] }
  0x7e   : > { %2343 = vmatprep.subr.bf16.mxu0 %v2342_v52  ;;  %v2392_v52 = vpack.c.bf16 %v1314_v42, %v1313_v41  ;;  %722 = vmatmul.mubr.f32.gmra.mrb[8].mxu1 %v313_v49  ;;  %v1337_v37 = vld [vmem:[%s3969_s3 + $0xe0] sm:$0xff]  ;;  %v1322_v42 = vld [vmem:[%s3969_s3 + $0x68] sm:$0xff] }
  0x7f   : > { %727 = vmatprep.mubr.f32.mxu1 %v321_v51  ;;  %2391 = vmatprep.subr.bf16.mxu1 %v2390_v50  ;;  %v1321_v41 = vld [vmem:[%s3969_s3 + $0x60] sm:$0xff]  ;;  %v2406_v50 = vpack.c.bf16 %v1338_v38, %v1337_v37  ;;  %v340_v37 = vld [vmem:[%s2773_s16 + $0x1b8] sm:$0xff]  ;;  %v347_v38 = vld [vmem:[%s2773_s16 + $0x1f0] sm:$0xff] }
  0x80   : > { %943 = vmatmul.mubr.f32.gmra.mrb[28].mxu0 %v385_v59  ;;  %v311_v59 = vld [vmem:[%s2773_s16 + $0xd0] sm:$0xff]  ;;  %2393 = vmatpush3.bf16.msra.mxu1 %v2392_v52  ;;  %v341_v49 = vld [vmem:[%s2773_s16 + $0x1c0] sm:$0xff]  ;;  %v2408_v52 = vpack.c.bf16 %v1322_v42, %v1321_v41  ;;  %v368_v41 = vld [vmem:[%s2773_s16 + $0x298] sm:$0xff] }
  0x81   : > { %2345 = vmatpush1.bf16.msra.mxu0 %v2344_v60  ;;  %948 = vmatprep.mubr.f32.mxu0 %v393_v61  ;;  %v2362_v60 = vpack.c.bf16 %v604_v48, %v602_v47  ;;  %v601_v61 = vld [vmem:[%s3967_s1 + $0x660] sm:$0xff]  ;;  %v618_v47 = vld [vmem:[%s3967_s1 + $0x6e8] sm:$0xff]  ;;  %v620_v48 = vld [vmem:[%s3967_s1 + $0x6f8] sm:$0xff] }
  0x82   : > { %2347 = vmatprep.subr.bf16.mxu0 %v2346_v62  ;;  %v603_v62 = vld [vmem:[%s3967_s1 + $0x670] sm:$0xff]  ;;  %728 = vmatmul.mubr.f32.gmra.mrb[10].mxu1 %v320_v1  ;;  %v349_v51 = vld [vmem:[%s2773_s16 + $0x200] sm:$0xff] }
  0x83   : > { %733 = vmatprep.mubr.f32.mxu1 %v328_v3  ;;  %2395 = vmatprep.subr.bf16.mxu1 %v2394_v2  ;;  %v363_v1 = vld [vmem:[%s2773_s16 + $0x270] sm:$0xff]  ;;  %v345_v2 = vld [vmem:[%s2773_s16 + $0x1e0] sm:$0xff] }
  0x84   : > { %949 = vmatmul.mubr.f32.gmra.mrb[30].mxu0 %v392_v5  ;;  %v1333_v5 = vld [vmem:[%s3969_s3 + $0xc0] sm:$0xff]  ;;  %2397 = vmatpush3.bf16.msra.mxu1 %v2396_v4  ;;  %v362_v4 = vld [vmem:[%s2773_s16 + $0x268] sm:$0xff]  ;;  %v375_v42 = vld [vmem:[%s2773_s16 + $0x2d0] sm:$0xff] }
  0x85   : > { %2349 = vmatpush1.bf16.msra.mxu0 %v2348_v6  ;;  %1019 = vmatprep.mubr.f32.mxu0 %v290_v7  ;;  %v1334_v6 = vld [vmem:[%s3969_s3 + $0xc8] sm:$0xff]  ;;  %v353_v3 = vld [vmem:[%s2773_s16 + $0x220] sm:$0xff] }
  0x86   : > { %2351 = vmatprep.subr.bf16.mxu0 %v2350_v8  ;;  %v310_v7 = vld [vmem:[%s2773_s16 + $0xc8] sm:$0xff]  ;;  %v2364_v8 = vpack.c.bf16 %v603_v62, %v601_v61  ;;  %v2398_v18 = vpack.c.bf16 %v1334_v6, %v1333_v5  ;;  %734 = vmatmul.mubr.f32.gmra.mrb[12].mxu1 %v327_v17  ;;  %v2380_v62 = vpack.c.bf16 %v619_v58, %v617_v57  ;;  %v352_v6 = vld [vmem:[%s2773_s16 + $0x218] sm:$0xff]  ;;  %v391_v17 = vld [vmem:[%s2773_s16 + $0x350] sm:$0xff] }
  0x87   : > { %739 = vmatprep.mubr.f32.mxu1 %v335_v19  ;;  %v338_v61 = vld [vmem:[%s2773_s16 + $0x1a8] sm:$0xff]  ;;  %v381_v19 = vld [vmem:[%s2773_s16 + $0x300] sm:$0xff] }
  0x88   : > { %1020 = vmatmul.mubr.f32.vlgmr.msra.gmra.mrb[0].mxu0 %v289_v12  ;;  %v2366_v12 = vpack.c.bf16 %v608_v0, %v606_v63  ;;  %2399 = vmatprep.subr.bf16.mxu1 %v2398_v18  ;;  %v346_v63 = vld [vmem:[%s2773_s16 + $0x1e8] sm:$0xff]  ;;  %v355_v0 = vld [vmem:[%s2773_s16 + $0x230] sm:$0xff]  ;;  %v373_v18 = vld [vmem:[%s2773_s16 + $0x2c0] sm:$0xff] }
  0x89   : > { %2353 = vmatpush1.bf16.msra.mxu0 %v2352_v21  ;;  %1025 = vmatprep.mubr.f32.mxu0 %v297_v16  ;;  %v612_v16 = vld [vmem:[%s3967_s1 + $0x6b8] sm:$0xff]  ;;  %v1335_v21 = vld [vmem:[%s3969_s3 + $0xd0] sm:$0xff]  ;;  %v370_v5 = vld [vmem:[%s2773_s16 + $0x2a8] sm:$0xff] }
  0x8a   : > { %2355 = vmatprep.subr.bf16.mxu0 %v2354_v26  ;;  %v1320_v26 = vld [vmem:[%s3969_s3 + $0x58] sm:$0xff]  ;;  %v2370_v28 = vpack.c.bf16 %v612_v16, %v610_v15  ;;  %v2402_v34 = vpack.c.bf16 %v1336_v22, %v1335_v21  ;;  %2401 = vmatpush3.bf16.msra.mxu1 %v2400_v20  ;;  %v374_v15 = vld [vmem:[%s2773_s16 + $0x2c8] sm:$0xff]  ;;  %v383_v16 = vld [vmem:[%s2773_s16 + $0x310] sm:$0xff] }
  0x8b   : > { %v2404_v36 = vpack.c.bf16 %v1320_v26, %v1319_v25  ;;  %740 = vmatmul.mubr.f32.gmra.mrb[14].mxu1 %v334_v33  ;;  %v390_v20 = vld [vmem:[%s2773_s16 + $0x348] sm:$0xff]  ;;  %v380_v21 = vld [vmem:[%s2773_s16 + $0x2f8] sm:$0xff]  ;;  %v2640_v26 = vmov 0.0   ;;  %v1509_v57 = vld [vmem:[%s3971_s5] sm:$0xff] }
  0x8c   : > { %1026 = vmatmul.mubr.f32.gmra.mrb[2].mxu0 %v296_v39  ;;  %v324_v39 = vld [vmem:[%s2773_s16 + $0x138] sm:$0xff]  ;;  %745 = vmatprep.mubr.f32.mxu1 %v342_v35  ;;  %v394_v25 = vld [vmem:[%s2773_s16 + $0x368] sm:$0xff] }
  0x8d   : > { %1031 = vmatprep.mubr.f32.mxu0 %v304_v43  ;;  %2357 = vmatpush1.bf16.msra.mxu0 %v2356_v40  ;;  %v2372_v40 = vpack.c.bf16 %v611_v30, %v609_v29  ;;  %v332_v43 = vld [vmem:[%s2773_s16 + $0x178] sm:$0xff]  ;;  %v305_v29 = vld [vmem:[%s2773_s16 + $0xa0] sm:$0xff]  ;;  %v326_v35 = vld [vmem:[%s2773_s16 + $0x148] sm:$0xff] }
  0x8e   : > { %2359 = vmatprep.subr.bf16.mxu0 %v2358_v44  ;;  %v2374_v44 = vpack.c.bf16 %v616_v32, %v614_v31  ;;  %2403 = vmatprep.subr.bf16.mxu1 %v2402_v34  ;;  %v388_v22 = vld [vmem:[%s2773_s16 + $0x338] sm:$0xff]  ;;  %v1339_v31 = vld [vmem:[%s3969_s3 + $0xf0] sm:$0xff]  ;;  %v1510_v58 = vld [vmem:[%s3971_s5 + $0x8] sm:$0xff] }
  0x8f   : > { %2405 = vmatpush3.bf16.msra.mxu1 %v2404_v36  ;;  %v312_v30 = vld [vmem:[%s2773_s16 + $0xd8] sm:$0xff]  ;;  %v319_v34 = vld [vmem:[%s2773_s16 + $0x110] sm:$0xff]  ;;  %v333_v36 = vld [vmem:[%s2773_s16 + $0x180] sm:$0xff] }
  0x90   : > { %1032 = vmatmul.mubr.f32.gmra.mrb[4].mxu0 %v303_v55  ;;  %v339_v55 = vld [vmem:[%s2773_s16 + $0x1b0] sm:$0xff]  ;;  %746 = vmatmul.mubr.f32.gmra.mrb[16].mxu1 %v341_v49  ;;  %v1340_v32 = vld [vmem:[%s3969_s3 + $0xf8] sm:$0xff] }
  0x91   : > { %1037 = vmatprep.mubr.f32.mxu0 %v311_v59  ;;  %2361 = vmatpush1.bf16.msra.mxu0 %v2360_v56  ;;  %v2378_v56 = vpack.c.bf16 %v620_v48, %v618_v47  ;;  %v348_v59 = vld [vmem:[%s2773_s16 + $0x1f8] sm:$0xff]  ;;  %v2410_v33 = vpack.c.bf16 %v1340_v32, %v1339_v31 }
  0x92   : > { %2363 = vmatprep.subr.bf16.mxu0 %v2362_v60  ;;  %751 = vmatprep.mubr.f32.mxu1 %v349_v51  ;;  %v356_v60 = vld [vmem:[%s2773_s16 + $0x238] sm:$0xff] }
  0x93   : > { %2407 = vmatprep.subr.bf16.mxu1 %v2406_v50  ;;  %v1324_v47 = vld [vmem:[%s3969_s3 + $0x78] sm:$0xff] }
  0x94   : > { %1038 = vmatmul.mubr.f32.gmra.mrb[6].mxu0 %v310_v7  ;;  %2409 = vmatpush3.bf16.msra.mxu1 %v2408_v52  ;;  %v360_v7 = vld [vmem:[%s2773_s16 + $0x258] sm:$0xff]  ;;  %v2412_v48 = vpack.c.bf16 %v1324_v47, %v1323_v46 }
  0x95   : > { %1043 = vmatprep.mubr.f32.mxu0 %v318_v11  ;;  %2365 = vmatpush1.bf16.msra.mxu0 %v2364_v8  ;;  %v369_v8 = vld [vmem:[%s2773_s16 + $0x2a0] sm:$0xff]  ;;  %v367_v11 = vld [vmem:[%s2773_s16 + $0x290] sm:$0xff] }
  0x96   : > { %2367 = vmatprep.subr.bf16.mxu0 %v2366_v12  ;;  %752 = vmatmul.mubr.f32.gmra.mrb[18].mxu1 %v348_v59  ;;  %v376_v12 = vld [vmem:[%s2773_s16 + $0x2d8] sm:$0xff]  ;;  %v2414_v59 = vpack.c.bf16 %v1510_v58, %v1509_v57 }
  0x97   : > { %757 = vmatprep.mubr.f32.mxu1 %v356_v60  ;;  %2411 = vmatprep.subr.bf16.mxu1 %v2410_v33 }
  0x98   : > { %1044 = vmatmul.mubr.f32.gmra.mrb[8].mxu0 %v317_v23  ;;  %v387_v23 = vld [vmem:[%s2773_s16 + $0x330] sm:$0xff]  ;;  %2413 = vmatpush3.bf16.msra.mxu1 %v2412_v48 }
  0x99   : > { %1049 = vmatprep.mubr.f32.mxu0 %v325_v27  ;;  %2369 = vmatpush1.bf16.msra.mxu0 %v2368_v24  ;;  %v395_v24 = vld [vmem:[%s2773_s16 + $0x370] sm:$0xff] }
  0x9a   : > { %2371 = vmatprep.subr.bf16.mxu0 %v2370_v28  ;;  %758 = vmatmul.mubr.f32.gmra.mrb[20].mxu1 %v355_v0  ;;  %v291_v27 = vld [vmem:[%s2773_s16 + $0x30] sm:$0xff]  ;;  %v298_v28 = vld [vmem:[%s2773_s16 + $0x68] sm:$0xff] }
  0x9b   : > { %763 = vmatprep.mubr.f32.mxu1 %v363_v1  ;;  %2415 = vmatprep.subr.bf16.mxu1 %v2414_v59 }
  0x9c   : > { %1050 = vmatmul.mubr.f32.gmra.mrb[10].mxu0 %v324_v39  ;;  %v354_v39 = vld [vmem:[%s2773_s16 + $0x228] sm:$0xff] }
  0x9d   : > { %1055 = vmatprep.mubr.f32.mxu0 %v332_v43  ;;  %2373 = vmatpush1.bf16.msra.mxu0 %v2372_v40  ;;  %v361_v40 = vld [vmem:[%s2773_s16 + $0x260] sm:$0xff]  ;;  %v382_v43 = vld [vmem:[%s2773_s16 + $0x308] sm:$0xff] }
  0x9e   : > { %2375 = vmatprep.subr.bf16.mxu0 %v2374_v44  ;;  %764 = vmatmul.mubr.f32.gmra.mrb[22].mxu1 %v362_v4  ;;  %v389_v44 = vld [vmem:[%s2773_s16 + $0x340] sm:$0xff] }
  0x9f   : > { %769 = vmatprep.mubr.f32.mxu1 %v370_v5 }
  0xa0   : > { %1056 = vmatmul.mubr.f32.gmra.mrb[12].mxu0 %v331_v53 }
  0xa1   : > { %1061 = vmatprep.mubr.f32.mxu0 %v339_v55  ;;  %2377 = vmatpush1.bf16.msra.mxu0 %v2376_v54 }
  0xa2   : > { %2379 = vmatprep.subr.bf16.mxu0 %v2378_v56  ;;  %770 = vmatmul.mubr.f32.gmra.mrb[24].mxu1 %v369_v8 }
  0xa3   : > { %775 = vmatprep.mubr.f32.mxu1 %v377_v9 }
  0xa4   : > { %1062 = vmatmul.mubr.f32.gmra.mrb[14].mxu0 %v338_v61 }
  0xa5   : > { %1067 = vmatprep.mubr.f32.mxu0 %v346_v63  ;;  %2381 = vmatpush1.bf16.msra.mxu0 %v2380_v62 }
  0xa6   : > { %776 = vmatmul.mubr.f32.gmra.mrb[26].mxu1 %v376_v12 }
  0xa7   : > { %781 = vmatprep.mubr.f32.mxu1 %v384_v13 }
  0xa8   : > { %1068 = vmatmul.mubr.f32.gmra.mrb[16].mxu0 %v345_v2 }
  0xa9   : > { %1073 = vmatprep.mubr.f32.mxu0 %v353_v3 }
  0xaa   : > { %782 = vmatmul.mubr.f32.gmra.mrb[28].mxu1 %v383_v16  ;;  %v623_v16 = vlaneseq }
  0xab   : > { %787 = vmatprep.mubr.f32.mxu1 %v391_v17 }
  0xac   : > { %1074 = vmatmul.mubr.f32.gmra.mrb[18].mxu0 %v352_v6 }
  0xad   : > { %1079 = vmatprep.mubr.f32.mxu0 %v360_v7 }
  0xae   : > { %788 = vmatmul.mubr.f32.gmra.mrb[30].mxu1 %v390_v20 }
  0xb0   : > { %1080 = vmatmul.mubr.f32.gmra.mrb[20].mxu0 %v359_v10 }
  0xb1   : > { %1085 = vmatprep.mubr.f32.mxu0 %v367_v11 }
  0xb4   : > { %1086 = vmatmul.mubr.f32.gmra.mrb[22].mxu0 %v366_v14 }
  0xb5   : > { %1091 = vmatprep.mubr.f32.mxu0 %v374_v15 }
  0xb8   : > { %1092 = vmatmul.mubr.f32.gmra.mrb[24].mxu0 %v373_v18 }
  0xb9   : > { %1097 = vmatprep.mubr.f32.mxu0 %v381_v19  ;;  %v624_v19 = vshrl.u32 %v623_v16, 7 }
  0xbc   : > { %1098 = vmatmul.mubr.f32.gmra.mrb[26].mxu0 %v380_v21 }
  0xbd   : > { %1103 = vmatprep.mubr.f32.mxu0 %v388_v22  ;;  %v625_v22 = vsub.s32 0, %v624_v19 }
  0xc0   : > { %1104 = vmatmul.mubr.f32.gmra.mrb[28].mxu0 %v387_v23  ;;  %v621_v23 = vld [vmem:[%s3968_s2] sm:$0x3] }
  0xc1   : > { %1109 = vmatprep.mubr.f32.mxu0 %v395_v24  ;;  %v629_v24 = vsub.s32 1, %v624_v19 }
  0xc4   : > { %1110 = vmatmul.mubr.f32.gmra.mrb[30].mxu0 %v394_v25  ;;  %v3639_v25 = vrot.slane %v621_v23, %v625_v22 }
  0xc5   : > { %1180 = vmatprep.mubr.f32.mxu0 %v2640_v26 }
  0xc8   : > { %1181 = vmatmul.mubr.f32.vlgmr.msra.gmra.mrb[0].mxu0 %v291_v27 }
  0xc9   : > { %1186 = vmatprep.mubr.f32.mxu0 %v2640_v26 }
  0xcc   : > { %1187 = vmatmul.mubr.f32.gmra.mrb[2].mxu0 %v298_v28 }
  0xcd   : > { %1192 = vmatprep.mubr.f32.mxu0 %v2640_v26 }
  0xd0   : > { %1193 = vmatmul.mubr.f32.gmra.mrb[4].mxu0 %v305_v29 }
  0xd1   : > { %1198 = vmatprep.mubr.f32.mxu0 %v2640_v26 }
  0xd4   : > { %1199 = vmatmul.mubr.f32.gmra.mrb[6].mxu0 %v312_v30 }
  0xd5   : > { %1204 = vmatprep.mubr.f32.mxu0 %v2640_v26 }
  0xd8   : > { %1205 = vmatmul.mubr.f32.gmra.mrb[8].mxu0 %v319_v34 }
  0xd9   : > { %1210 = vmatprep.mubr.f32.mxu0 %v2640_v26 }
  0xdc   : > { %1211 = vmatmul.mubr.f32.gmra.mrb[10].mxu0 %v326_v35  ;;  %v1511_v35 = vld [vmem:[%s3971_s5 + $0x10] sm:$0xff] }
  0xdd   : > { %1216 = vmatprep.mubr.f32.mxu0 %v2640_v26 }
  0xe0   : > { %1217 = vmatmul.mubr.f32.gmra.mrb[12].mxu0 %v333_v36  ;;  %v1512_v36 = vld [vmem:[%s3971_s5 + $0x18] sm:$0xff] }
  0xe1   : > { %1222 = vmatprep.mubr.f32.mxu0 %v2640_v26 }
  0xe4   : > { %1223 = vmatmul.mubr.f32.gmra.mrb[14].mxu0 %v340_v37 }
  0xe5   : > { %1228 = vmatprep.mubr.f32.mxu0 %v2640_v26 }
  0xe8   : > { %1229 = vmatmul.mubr.f32.gmra.mrb[16].mxu0 %v347_v38 }
  0xe9   : > { %1234 = vmatprep.mubr.f32.mxu0 %v2640_v26 }
  0xec   : > { %1235 = vmatmul.mubr.f32.gmra.mrb[18].mxu0 %v354_v39 }
  0xed   : > { %1240 = vmatprep.mubr.f32.mxu0 %v2640_v26 }
  0xf0   : > { %1241 = vmatmul.mubr.f32.gmra.mrb[20].mxu0 %v361_v40 }
  0xf1   : > { %1246 = vmatprep.mubr.f32.mxu0 %v2640_v26 }
  0xf4   : > { %1247 = vmatmul.mubr.f32.gmra.mrb[22].mxu0 %v368_v41 }
  0xf5   : > { %1252 = vmatprep.mubr.f32.mxu0 %v2640_v26 }
  0xf8   : > { %1253 = vmatmul.mubr.f32.gmra.mrb[24].mxu0 %v375_v42 }
  0xf9   : > { %1258 = vmatprep.mubr.f32.mxu0 %v2640_v26 }
  0xfc   : > { %1259 = vmatmul.mubr.f32.gmra.mrb[26].mxu0 %v382_v43  ;;  %v2418_v43 = vpack.c.bf16 %v1512_v36, %v1511_v35 }
  0xfd   : > { %1264 = vmatprep.mubr.f32.mxu0 %v2640_v26 }
 0x100   : > { %1265 = vmatmul.mubr.f32.gmra.mrb[28].mxu0 %v389_v44 }
 0x101   : > { %1270 = vmatprep.mubr.f32.mxu0 %v2640_v26  ;;  %v3641_v26 = vrot.slane %v621_v23, %v629_v24 }
 0x104   : > { %1271 = vmatmul.mubr.f32.gmra.mrb[30].mxu0 %v396_v45 }
 0x141   : > { %v699_v49 = vpop.f32.mrb[0].mxu1 }
 0x142   : > { %v701_v50 = vpop.f32.mrb[1].mxu1  ;;  %v700_v27 = vadd.f32 %v699_v49, %v3639_v25 }
 0x143   : > { %v702_v28 = vadd.f32 %v701_v50, %v3641_v26 }
 0x145   : > { %v705_v51 = vpop.f32.mrb[2].mxu1 }
 0x146   : > { %v707_v52 = vpop.f32.mrb[3].mxu1  ;;  %v706_v32 = vadd.f32 %v705_v51, %v3639_v25 }
 0x147   : > { %v708_v34 = vadd.f32 %v707_v52, %v3641_v26 }
 0x149   : > { %v711_v53 = vpop.f32.mrb[4].mxu1 }
 0x14a   : > { %v713_v54 = vpop.f32.mrb[5].mxu1  ;;  %v712_v42 = vadd.f32 %v711_v53, %v3639_v25 }
 0x14b   : > { %v714_v45 = vadd.f32 %v713_v54, %v3641_v26 }
 0x14d   : > { %v3577_v55 = vpop.f32.mrb[6].mxu1 }
 0x14e   : > { %v3579_v56 = vpop.f32.mrb[7].mxu1  ;;  %v718_v51 = vadd.f32 %v3577_v55, %v3639_v25 }
 0x14f   : > { %v720_v53 = vadd.f32 %v3579_v56, %v3641_v26 }
 0x151   : > { %v3587_v60 = vpop.f32.mrb[8].mxu1 }
 0x152   : > { %v3589_v61 = vpop.f32.mrb[9].mxu1 }
 0x153   : > { %v726_v55 = vadd.f32 %v3589_v61, %v3641_v26 }
 0x155   : > { %v3591_v62 = vpop.f32.mrb[10].mxu1 }
 0x156   : > { %v3593_v63 = vpop.f32.mrb[11].mxu1 }
 0x159   : > { %v3595_v0 = vpop.f32.mrb[12].mxu1 }
 0x15a   : > { %v3597_v1 = vpop.f32.mrb[13].mxu1  ;;  %v736_v36 = vadd.f32 %v3595_v0, %v3639_v25 }
 0x15e   : > { %v3599_v2 = vpop.f32.mrb[14].mxu1 }
 0x15f   : > { %v3601_v3 = vpop.f32.mrb[15].mxu1 }
 0x163   : > { %v3603_v4 = vpop.f32.mrb[16].mxu1 }
 0x164   : > { %v3605_v5 = vpop.f32.mrb[17].mxu1 }
 0x169   : > { %v3607_v6 = vpop.f32.mrb[18].mxu1 }
 0x16a   : > { %v3609_v7 = vpop.f32.mrb[19].mxu1 }
 0x16d   : > { %v3611_v8 = vpop.f32.mrb[20].mxu1 }
 0x16e   : > { %v3613_v9 = vpop.f32.mrb[21].mxu1 }
 0x171   : > { %v3615_v10 = vpop.f32.mrb[22].mxu1 }
 0x172   : > { %v3617_v11 = vpop.f32.mrb[23].mxu1 }
 0x175   : > { %v3619_v12 = vpop.f32.mrb[24].mxu1 }
 0x176   : > { %v3621_v13 = vpop.f32.mrb[25].mxu1 }
 0x179   : > { %v3623_v14 = vpop.f32.mrb[26].mxu1 }
 0x17a   : > { %v3625_v15 = vpop.f32.mrb[27].mxu1 }
 0x17d   : > { %v3627_v17 = vpop.f32.mrb[28].mxu1 }
 0x17e   : > { %v3629_v18 = vpop.f32.mrb[29].mxu1 }
 0x181   : > { %v3632_v20 = vpop.f32.mrb[30].mxu1 }
 0x182   : > { %v3634_v21 = vpop.f32.mrb[31].mxu1 }
 0x19b   : > { %v1182_v29 = vpop.f32.mrb[0].mxu0 }
 0x19c   : > { %v2431_v30 = vadd.f32 %v1182_v29, %v700_v27  ;;  %v1184_v31 = vpop.f32.mrb[1].mxu0 }
 0x19d   : > { %v2433_v33 = vadd.f32 %v1184_v31, %v702_v28 }
 0x19e   : > { %v1277_v39 = vmax.f32 %v2431_v30, 0.0  ;;  %v730_v30 = vadd.f32 %v3591_v62, %v3639_v25 }
 0x19f   : > { %v1278_v37 = vmax.f32 %v2433_v33, 0.0  ;;  %v1188_v38 = vpop.f32.mrb[2].mxu0 }
 0x1a0   : > { %v2435_v40 = vadd.f32 %v1188_v38, %v706_v32  ;;  %v1190_v41 = vpop.f32.mrb[3].mxu0  ;;  %v732_v32 = vadd.f32 %v3593_v63, %v3641_v26  ;;  %v738_v38 = vadd.f32 %v3597_v1, %v3641_v26 }
 0x1a1   : > { %v2437_v44 = vadd.f32 %v1190_v41, %v708_v34  ;;  %1412 = vmatprep.mubr.f32.mxu1 %v1278_v37 }
 0x1a2   : > { %1413 = vmatmul.mubr.f32.vlgmr.msra.gmra.mrb[32].mxu1 %v1277_v39  ;;  %v1279_v48 = vmax.f32 %v2435_v40, 0.0 }
 0x1a3   : > { %v1280_v46 = vmax.f32 %v2437_v44, 0.0  ;;  %v1194_v47 = vpop.f32.mrb[4].mxu0  ;;  %2417 = vmatpush3.bf16.msra.mxu1 %v2414_v59  ;;  %v724_v59 = vadd.f32 %v3587_v60, %v3639_v25  ;;  %v744_v44 = vadd.f32 %v3601_v3, %v3641_v26 }
 0x1a4   : > { %v2439_v49 = vadd.f32 %v1194_v47, %v712_v42  ;;  %v1196_v50 = vpop.f32.mrb[5].mxu0  ;;  %2419 = vmatprep.subr.bf16.mxu1 %v2418_v43  ;;  %v742_v42 = vadd.f32 %v3599_v2, %v3639_v25 }
 0x1a5   : > { %v2441_v52 = vadd.f32 %v1196_v50, %v714_v45  ;;  %1417 = vmatprep.mubr.f32.mxu1 %v1280_v46  ;;  %v750_v50 = vadd.f32 %v3605_v5, %v3641_v26 }
 0x1a6   : > { %1418 = vmatmul.mubr.f32.gmra.mrb[34].mxu1 %v1279_v48  ;;  %v1281_v54 = vmax.f32 %v2439_v49, 0.0  ;;  %v748_v48 = vadd.f32 %v3603_v4, %v3639_v25 }
 0x1a7   : > { %v1282_v57 = vmax.f32 %v2441_v52, 0.0  ;;  %v1200_v58 = vpop.f32.mrb[6].mxu0  ;;  %2421 = vmatpush3.bf16.msra.mxu1 %v2418_v43 }
 0x1a8   : > { %v2443_v19 = vadd.f32 %v1200_v58, %v718_v51  ;;  %v1202_v22 = vpop.f32.mrb[7].mxu0 }
 0x1a9   : > { %v2445_v23 = vadd.f32 %v1202_v22, %v720_v53  ;;  %1422 = vmatprep.mubr.f32.mxu1 %v1282_v57  ;;  %v754_v57 = vadd.f32 %v3607_v6, %v3639_v25 }
 0x1aa   : > { %1423 = vmatmul.mubr.f32.gmra.mrb[36].mxu1 %v1281_v54  ;;  %v1283_v28 = vmax.f32 %v2443_v19, 0.0  ;;  %v756_v54 = vadd.f32 %v3609_v7, %v3641_v26 }
 0x1ab   : > { %v1284_v24 = vmax.f32 %v2445_v23, 0.0  ;;  %v1206_v27 = vpop.f32.mrb[8].mxu0  ;;  %v760_v23 = vadd.f32 %v3611_v8, %v3639_v25 }
 0x1ac   : > { %v2447_v56 = vadd.f32 %v1206_v27, %v724_v59  ;;  %v1208_v29 = vpop.f32.mrb[9].mxu0 }
 0x1ad   : > { %v2449_v31 = vadd.f32 %v1208_v29, %v726_v55  ;;  %1427 = vmatprep.mubr.f32.mxu1 %v1284_v24  ;;  %v762_v24 = vadd.f32 %v3613_v9, %v3641_v26  ;;  %v766_v29 = vadd.f32 %v3615_v10, %v3639_v25 }
 0x1ae   : > { %1428 = vmatmul.mubr.f32.gmra.mrb[38].mxu1 %v1283_v28  ;;  %v1285_v34 = vmax.f32 %v2447_v56, 0.0 }
 0x1af   : > { %v1286_v60 = vmax.f32 %v2449_v31, 0.0  ;;  %v1212_v33 = vpop.f32.mrb[10].mxu0  ;;  %v768_v31 = vadd.f32 %v3617_v11, %v3641_v26 }
 0x1b0   : > { %v2451_v35 = vadd.f32 %v1212_v33, %v730_v30  ;;  %v1214_v61 = vpop.f32.mrb[11].mxu0 }
 0x1b1   : > { %v2453_v37 = vadd.f32 %v1214_v61, %v732_v32  ;;  %1432 = vmatprep.mubr.f32.mxu1 %v1286_v60  ;;  %v774_v61 = vadd.f32 %v3621_v13, %v3641_v26 }
 0x1b2   : > { %1433 = vmatmul.mubr.f32.gmra.mrb[40].mxu1 %v1285_v34  ;;  %v1287_v40 = vmax.f32 %v2451_v35, 0.0  ;;  %v772_v34 = vadd.f32 %v3619_v12, %v3639_v25 }
 0x1b3   : > { %v1288_v62 = vmax.f32 %v2453_v37, 0.0  ;;  %v1218_v39 = vpop.f32.mrb[12].mxu0 }
 0x1b4   : > { %v2455_v41 = vadd.f32 %v1218_v39, %v736_v36  ;;  %v1220_v63 = vpop.f32.mrb[13].mxu0 }
 0x1b5   : > { %v2457_v43 = vadd.f32 %v1220_v63, %v738_v38  ;;  %1437 = vmatprep.mubr.f32.mxu1 %v1288_v62  ;;  %v778_v62 = vadd.f32 %v3623_v14, %v3639_v25 }
 0x1b6   : > { %1438 = vmatmul.mubr.f32.gmra.mrb[42].mxu1 %v1287_v40  ;;  %v1289_v46 = vmax.f32 %v2455_v41, 0.0  ;;  %v780_v40 = vadd.f32 %v3625_v15, %v3641_v26 }
 0x1b7   : > { %v1290_v0 = vmax.f32 %v2457_v43, 0.0  ;;  %v1224_v45 = vpop.f32.mrb[14].mxu0  ;;  %v784_v43 = vadd.f32 %v3627_v17, %v3639_v25 }
 0x1b8   : > { %v2459_v47 = vadd.f32 %v1224_v45, %v742_v42  ;;  %v1226_v1 = vpop.f32.mrb[15].mxu0 }
 0x1b9   : > { %v2461_v49 = vadd.f32 %v1226_v1, %v744_v44  ;;  %1442 = vmatprep.mubr.f32.mxu1 %v1290_v0  ;;  %v786_v0 = vadd.f32 %v3629_v18, %v3641_v26  ;;  %v790_v1 = vadd.f32 %v3632_v20, %v3639_v25  ;;  %v1513_v20 = vld [vmem:[%s3971_s5 + $0x20] sm:$0xff] }
 0x1ba   : > { %1443 = vmatmul.mubr.f32.gmra.mrb[44].mxu1 %v1289_v46  ;;  %v1291_v52 = vmax.f32 %v2459_v47, 0.0 }
 0x1bb   : > { %v1292_v2 = vmax.f32 %v2461_v49, 0.0  ;;  %v1230_v51 = vpop.f32.mrb[16].mxu0  ;;  %v792_v49 = vadd.f32 %v3634_v21, %v3641_v26  ;;  %v1514_v21 = vld [vmem:[%s3971_s5 + $0x28] sm:$0xff]  ;;  %v1515_v26 = vld [vmem:[%s3971_s5 + $0x30] sm:$0xff] }
 0x1bc   : > { %v2463_v53 = vadd.f32 %v1230_v51, %v748_v48  ;;  %v1232_v3 = vpop.f32.mrb[17].mxu0  ;;  %v2422_v25 = vpack.c.bf16 %v1514_v21, %v1513_v20 }
 0x1bd   : > { %v2465_v58 = vadd.f32 %v1232_v3, %v750_v50  ;;  %1447 = vmatprep.mubr.f32.mxu1 %v1292_v2 }
 0x1be   : > { %1448 = vmatmul.mubr.f32.gmra.mrb[46].mxu1 %v1291_v52  ;;  %v1293_v22 = vmax.f32 %v2463_v53, 0.0  ;;  %2423 = vmatprep.subr.bf16.mxu1 %v2422_v25 }
 0x1bf   : > { %v1294_v4 = vmax.f32 %v2465_v58, 0.0  ;;  %v1236_v19 = vpop.f32.mrb[18].mxu0  ;;  %2425 = vmatpush3.bf16.msra.mxu1 %v2422_v25 }
 0x1c0   : > { %v2467_v59 = vadd.f32 %v1236_v19, %v754_v57  ;;  %v1238_v5 = vpop.f32.mrb[19].mxu0  ;;  %v1516_v57 = vld [vmem:[%s3971_s5 + $0x38] sm:$0xff] }
 0x1c1   : > { %v2469_v55 = vadd.f32 %v1238_v5, %v756_v54  ;;  %1452 = vmatprep.mubr.f32.mxu1 %v1294_v4  ;;  %v2426_v58 = vpack.c.bf16 %v1516_v57, %v1515_v26  ;;  %v3722_v4 = vld [vmem:[%s3970_s4] ss:$0 sm:$0xff] }
 0x1c2   : > { %1453 = vmatmul.mubr.f32.gmra.mrb[48].mxu1 %v1293_v22  ;;  %v1295_v28 = vmax.f32 %v2467_v59, 0.0 }
 0x1c3   : > { %v1296_v6 = vmax.f32 %v2469_v55, 0.0  ;;  %v1242_v27 = vpop.f32.mrb[20].mxu0  ;;  %2427 = vmatprep.subr.bf16.mxu1 %v2426_v58 }
 0x1c4   : > { %v2471_v56 = vadd.f32 %v1242_v27, %v760_v23  ;;  %v1244_v7 = vpop.f32.mrb[21].mxu0  ;;  %2429 = vmatpush3.bf16.msra.mxu1 %v2426_v58 }
 0x1c5   : > { %v2473_v30 = vadd.f32 %v1244_v7, %v762_v24  ;;  %1457 = vmatprep.mubr.f32.mxu1 %v1296_v6 }
 0x1c6   : > { %1458 = vmatmul.mubr.f32.gmra.mrb[50].mxu1 %v1295_v28  ;;  %v1297_v60 = vmax.f32 %v2471_v56, 0.0 }
 0x1c7   : > { %v1298_v8 = vmax.f32 %v2473_v30, 0.0  ;;  %v1248_v32 = vpop.f32.mrb[22].mxu0 }
 0x1c8   : > { %v2475_v33 = vadd.f32 %v1248_v32, %v766_v29  ;;  %v1250_v9 = vpop.f32.mrb[23].mxu0 }
 0x1c9   : > { %v2477_v35 = vadd.f32 %v1250_v9, %v768_v31  ;;  %1462 = vmatprep.mubr.f32.mxu1 %v1298_v8 }
 0x1ca   : > { %1463 = vmatmul.mubr.f32.gmra.mrb[52].mxu1 %v1297_v60  ;;  %v1299_v37 = vmax.f32 %v2475_v33, 0.0 }
 0x1cb   : > { %v1300_v10 = vmax.f32 %v2477_v35, 0.0  ;;  %v1254_v36 = vpop.f32.mrb[24].mxu0 }
 0x1cc   : > { %v2479_v38 = vadd.f32 %v1254_v36, %v772_v34  ;;  %v1256_v11 = vpop.f32.mrb[25].mxu0 }
 0x1cd   : > { %v2481_v39 = vadd.f32 %v1256_v11, %v774_v61  ;;  %1467 = vmatprep.mubr.f32.mxu1 %v1300_v10 }
 0x1ce   : > { %1468 = vmatmul.mubr.f32.gmra.mrb[54].mxu1 %v1299_v37  ;;  %v1301_v63 = vmax.f32 %v2479_v38, 0.0 }
 0x1cf   : > { %v1302_v12 = vmax.f32 %v2481_v39, 0.0  ;;  %v1260_v41 = vpop.f32.mrb[26].mxu0 }
 0x1d0   : > { %v2483_v42 = vadd.f32 %v1260_v41, %v778_v62  ;;  %v1262_v13 = vpop.f32.mrb[27].mxu0 }
 0x1d1   : > { %v2485_v44 = vadd.f32 %v1262_v13, %v780_v40  ;;  %1472 = vmatprep.mubr.f32.mxu1 %v1302_v12 }
 0x1d2   : > { %1473 = vmatmul.mubr.f32.gmra.mrb[56].mxu1 %v1301_v63  ;;  %v1303_v46 = vmax.f32 %v2483_v42, 0.0 }
 0x1d3   : > { %v1304_v14 = vmax.f32 %v2485_v44, 0.0  ;;  %v1266_v45 = vpop.f32.mrb[28].mxu0 }
 0x1d4   : > { %v2487_v47 = vadd.f32 %v1266_v45, %v784_v43  ;;  %v1268_v15 = vpop.f32.mrb[29].mxu0 }
 0x1d5   : > { %v2489_v48 = vadd.f32 %v1268_v15, %v786_v0  ;;  %1477 = vmatprep.mubr.f32.mxu1 %v1304_v14 }
 0x1d6   : > { %1478 = vmatmul.mubr.f32.gmra.mrb[58].mxu1 %v1303_v46  ;;  %v1305_v2 = vmax.f32 %v2487_v47, 0.0 }
 0x1d7   : > { %v1306_v17 = vmax.f32 %v2489_v48, 0.0  ;;  %v1272_v50 = vpop.f32.mrb[30].mxu0 }
 0x1d8   : > { %v2491_v51 = vadd.f32 %v1272_v50, %v790_v1  ;;  %v1274_v18 = vpop.f32.mrb[31].mxu0 }
 0x1d9   : > { %v2493_v52 = vadd.f32 %v1274_v18, %v792_v49  ;;  %1482 = vmatprep.mubr.f32.mxu1 %v1306_v17 }
 0x1da   : > { %1483 = vmatmul.mubr.f32.gmra.mrb[60].mxu1 %v1305_v2  ;;  %v1307_v3 = vmax.f32 %v2491_v51, 0.0 }
 0x1db   : > { %v1308_v53 = vmax.f32 %v2493_v52, 0.0 }
 0x1dd   : > { %1487 = vmatprep.mubr.f32.mxu1 %v1308_v53 }
 0x1de   : > { %1488 = vmatmul.mubr.f32.gmra.mrb[62].mxu1 %v1307_v3 }
 0x275   : > { %v2046_v54 = vpop.f32.mrb[32].mxu1 }
 0x276   : > { %v2047_v19 = vpop.f32.mrb[33].mxu1 }
 0x277   : > { %v2048_v22 = vadd.f32 %v2047_v19, %v2046_v54 }
 0x279   : > { %v1415_v59 = vadd.f32 %v2048_v22, %v3722_v4  ;;  %v2049_v5 = vpop.f32.mrb[34].mxu1 }
 0x27a   : > { %v2050_v23 = vpop.f32.mrb[35].mxu1 }
 0x27b   : > { %v1493_v55 = vmax.f32 %v1415_v59, 0.0  ;;  %v2051_v24 = vadd.f32 %v2050_v23, %v2049_v5 }
 0x27d   : > { %v1420_v6 = vadd.f32 %v2051_v24, %v3722_v4  ;;  %v2052_v27 = vpop.f32.mrb[36].mxu1  ;;  %2134 = vmatprep.mubr.msk.f32.mxu1 %vm1524_vm0, %v1493_v55 }
 0x27e   : > { %v2053_v28 = vpop.f32.mrb[37].mxu1 }
 0x27f   : > { %v1494_v56 = vmax.f32 %v1420_v6, 0.0  ;;  %v2054_v7 = vadd.f32 %v2053_v28, %v2052_v27 }
 0x281   : > { %v1425_v29 = vadd.f32 %v2054_v7, %v3722_v4  ;;  %v2055_v30 = vpop.f32.mrb[38].mxu1  ;;  %2135 = vmatmul.mubr.msk.f32.vlgmr.msra.gmra.mrb[64].mxu1 %vm1524_vm0, %v1494_v56 }
 0x282   : > { %v2056_v31 = vpop.f32.mrb[39].mxu1 }
 0x283   : > { %v1495_v8 = vmax.f32 %v1425_v29, 0.0  ;;  %v2057_v32 = vadd.f32 %v2056_v31, %v2055_v30 }
 0x285   : > { %v1430_v60 = vadd.f32 %v2057_v32, %v3722_v4  ;;  %v2058_v33 = vpop.f32.mrb[40].mxu1  ;;  %2137 = vmatprep.mubr.msk.f32.mxu1 %vm1524_vm0, %v1495_v8 }
 0x286   : > { %v2059_v9 = vpop.f32.mrb[41].mxu1 }
 0x287   : > { %v1496_v34 = vmax.f32 %v1430_v60, 0.0  ;;  %v2060_v35 = vadd.f32 %v2059_v9, %v2058_v33  ;;  %v3759_v60 = vld [vmem:[%s3972_s6] ss:$0 sm:$0xff]  ;;  %v3762_v33 = vand.u32 127, %v623_v16 }
 0x289   : > { %v1435_v61 = vadd.f32 %v2060_v35, %v3722_v4  ;;  %v2061_v10 = vpop.f32.mrb[42].mxu1  ;;  %2138 = vmatmul.mubr.msk.f32.gmra.mrb[66].mxu1 %vm1524_vm0, %v1496_v34  ;;  %vm1736_vm1 = vcmp.lt.s32.totalorder %v3762_v33, 10 }
 0x28a   : > { %v2062_v36 = vpop.f32.mrb[43].mxu1 }
 0x28b   : > { %v1497_v37 = vmax.f32 %v1435_v61, 0.0  ;;  %v2063_v38 = vadd.f32 %v2062_v36, %v2061_v10 }
 0x28d   : > { %v1440_v11 = vadd.f32 %v2063_v38, %v3722_v4  ;;  %v2064_v62 = vpop.f32.mrb[44].mxu1  ;;  %2140 = vmatprep.mubr.msk.f32.mxu1 %vm1524_vm0, %v1497_v37 }
 0x28e   : > { %v2065_v39 = vpop.f32.mrb[45].mxu1 }
 0x28f   : > { %v1498_v40 = vmax.f32 %v1440_v11, 0.0  ;;  %v2066_v12 = vadd.f32 %v2065_v39, %v2064_v62 }
 0x291   : > { %v1445_v41 = vadd.f32 %v2066_v12, %v3722_v4  ;;  %v2067_v63 = vpop.f32.mrb[46].mxu1  ;;  %2141 = vmatmul.mubr.msk.f32.gmra.mrb[68].mxu1 %vm1524_vm0, %v1498_v40 }
 0x292   : > { %v2068_v42 = vpop.f32.mrb[47].mxu1 }
 0x293   : > { %v1499_v13 = vmax.f32 %v1445_v41, 0.0  ;;  %v2069_v43 = vadd.f32 %v2068_v42, %v2067_v63 }
 0x295   : > { %v1450_v44 = vadd.f32 %v2069_v43, %v3722_v4  ;;  %v2070_v0 = vpop.f32.mrb[48].mxu1  ;;  %2143 = vmatprep.mubr.msk.f32.mxu1 %vm1524_vm0, %v1499_v13 }
 0x296   : > { %v2071_v14 = vpop.f32.mrb[49].mxu1 }
 0x297   : > { %v1500_v45 = vmax.f32 %v1450_v44, 0.0  ;;  %v2072_v46 = vadd.f32 %v2071_v14, %v2070_v0 }
 0x299   : > { %v1455_v47 = vadd.f32 %v2072_v46, %v3722_v4  ;;  %v2073_v15 = vpop.f32.mrb[50].mxu1  ;;  %2144 = vmatmul.mubr.msk.f32.gmra.mrb[70].mxu1 %vm1524_vm0, %v1500_v45 }
 0x29a   : > { %v2074_v1 = vpop.f32.mrb[51].mxu1 }
 0x29b   : > { %v1501_v48 = vmax.f32 %v1455_v47, 0.0  ;;  %v2075_v49 = vadd.f32 %v2074_v1, %v2073_v15 }
 0x29d   : > { %v1460_v17 = vadd.f32 %v2075_v49, %v3722_v4  ;;  %v2076_v50 = vpop.f32.mrb[52].mxu1  ;;  %2146 = vmatprep.mubr.msk.f32.mxu1 %vm1524_vm0, %v1501_v48 }
 0x29e   : > { %v2077_v2 = vpop.f32.mrb[53].mxu1 }
 0x29f   : > { %v1502_v51 = vmax.f32 %v1460_v17, 0.0  ;;  %v2078_v18 = vadd.f32 %v2077_v2, %v2076_v50 }
 0x2a1   : > { %v1465_v52 = vadd.f32 %v2078_v18, %v3722_v4  ;;  %v2079_v53 = vpop.f32.mrb[54].mxu1  ;;  %2147 = vmatmul.mubr.msk.f32.gmra.mrb[72].mxu1 %vm1524_vm0, %v1502_v51 }
 0x2a2   : > { %v2080_v3 = vpop.f32.mrb[55].mxu1 }
 0x2a3   : > { %v1503_v20 = vmax.f32 %v1465_v52, 0.0  ;;  %v2081_v21 = vadd.f32 %v2080_v3, %v2079_v53 }
 0x2a5   : > { %v1470_v25 = vadd.f32 %v2081_v21, %v3722_v4  ;;  %v2082_v26 = vpop.f32.mrb[56].mxu1  ;;  %2149 = vmatprep.mubr.msk.f32.mxu1 %vm1524_vm0, %v1503_v20 }
 0x2a6   : > { %v2083_v57 = vpop.f32.mrb[57].mxu1 }
 0x2a7   : > { %v1504_v58 = vmax.f32 %v1470_v25, 0.0  ;;  %v2084_v54 = vadd.f32 %v2083_v57, %v2082_v26 }
 0x2a9   : > { %v1475_v19 = vadd.f32 %v2084_v54, %v3722_v4  ;;  %v2085_v22 = vpop.f32.mrb[58].mxu1  ;;  %2150 = vmatmul.mubr.msk.f32.gmra.mrb[74].mxu1 %vm1524_vm0, %v1504_v58 }
 0x2aa   : > { %v2086_v59 = vpop.f32.mrb[59].mxu1 }
 0x2ab   : > { %v1505_v5 = vmax.f32 %v1475_v19, 0.0  ;;  %v2087_v23 = vadd.f32 %v2086_v59, %v2085_v22 }
 0x2ad   : > { %v1480_v55 = vadd.f32 %v2087_v23, %v3722_v4  ;;  %v2088_v24 = vpop.f32.mrb[60].mxu1  ;;  %2152 = vmatprep.mubr.msk.f32.mxu1 %vm1524_vm0, %v1505_v5 }
 0x2ae   : > { %v2089_v6 = vpop.f32.mrb[61].mxu1 }
 0x2af   : > { %v1506_v27 = vmax.f32 %v1480_v55, 0.0  ;;  %v2090_v28 = vadd.f32 %v2089_v6, %v2088_v24 }
 0x2b1   : > { %v1485_v56 = vadd.f32 %v2090_v28, %v3722_v4  ;;  %v2091_v7 = vpop.f32.mrb[62].mxu1  ;;  %2153 = vmatmul.mubr.msk.f32.gmra.mrb[76].mxu1 %vm1524_vm0, %v1506_v27 }
 0x2b2   : > { %v2092_v29 = vpop.f32.mrb[63].mxu1 }
 0x2b3   : > { %v1507_v30 = vmax.f32 %v1485_v56, 0.0  ;;  %v2093_v31 = vadd.f32 %v2092_v29, %v2091_v7 }
 0x2b5   : > { %v1490_v8 = vadd.f32 %v2093_v31, %v3722_v4  ;;  %2155 = vmatprep.mubr.msk.f32.mxu1 %vm1524_vm0, %v1507_v30 }
 0x2b7   : > { %v1508_v32 = vmax.f32 %v1490_v8, 0.0 }
 0x2b9   : > { %2156 = vmatmul.mubr.msk.f32.gmra.mrb[78].mxu1 %vm1524_vm0, %v1508_v32 }
 0x354   : > { %v2136_v9 = vpop.f32.mrb[64].mxu1 }
 0x355   : > { %v1645_v34 = vadd.f32 %v2136_v9, %v3759_v60  ;;  %v1639_v35 = vpop.f32.mrb[65].mxu1 }
 0x356   : > { %v1640_v61 = vadd.f32 %v3759_v60, %v1639_v35 }
 0x357   : > { %v1719_v4 = vmax.f32 %v1645_v34, 0.0 }
 0x358   : > { %v1718_v10 = vmax.f32 %v1640_v61, 0.0 }
 0x359   : > { %v3769_v36 = vsel %vm1736_vm1, %v1719_v4, -1e+30 }
 0x35a   : > { %1755 = vmax.xlane.f32.xlu0 %v3769_v36  ;;  %v3775_v11 = vsel %vm1736_vm1, %v1718_v10, -1e+30 }
 0x35c   : > { %v2139_v37 = vpop.f32.mrb[66].mxu1 }
 0x35d   : > { %v1655_v16 = vadd.f32 %v2139_v37, %v3759_v60  ;;  %v1649_v38 = vpop.f32.mrb[67].mxu1 }
 0x35e   : > { %v1650_v62 = vadd.f32 %v3759_v60, %v1649_v38  ;;  %1753 = vmax.xlane.f32.xlu0 %v3775_v11 }
 0x35f   : > { %v1721_v39 = vmax.f32 %v1655_v16, 0.0 }
 0x360   : > { %v1720_v40 = vmax.f32 %v1650_v62, 0.0 }
 0x361   : > { %v3781_v12 = vsel %vm1736_vm1, %v1721_v39, -1e+30 }
 0x362   : > { %1759 = vmax.xlane.f32.xlu1 %v3781_v12  ;;  %v3787_v13 = vsel %vm1736_vm1, %v1720_v40, -1e+30 }
 0x364   : > { %v2142_v41 = vpop.f32.mrb[68].mxu1 }
 0x365   : > { %v1665_v63 = vadd.f32 %v2142_v41, %v3759_v60  ;;  %v1659_v42 = vpop.f32.mrb[69].mxu1 }
 0x366   : > { %v1660_v43 = vadd.f32 %v3759_v60, %v1659_v42  ;;  %1757 = vmax.xlane.f32.xlu1 %v3787_v13 }
 0x367   : > { %v1723_v44 = vmax.f32 %v1665_v63, 0.0 }
 0x368   : > { %v1722_v0 = vmax.f32 %v1660_v43, 0.0 }
 0x369   : > { %v3793_v14 = vsel %vm1736_vm1, %v1723_v44, -1e+30 }
 0x36a   : > { %1763 = vmax.xlane.f32.xlu1 %v3793_v14  ;;  %v3798_v45 = vsel %vm1736_vm1, %v1722_v0, -1e+30 }
 0x36b   : > { %1761 = vmax.xlane.f32.xlu0 %v3798_v45 }
 0x36c   : > { %v2145_v46 = vpop.f32.mrb[70].mxu1 }
 0x36d   : > { %v1675_v47 = vadd.f32 %v2145_v46, %v3759_v60  ;;  %v1669_v15 = vpop.f32.mrb[71].mxu1 }
 0x36e   : > { %v1670_v1 = vadd.f32 %v3759_v60, %v1669_v15 }
 0x36f   : > { %v1725_v48 = vmax.f32 %v1675_v47, 0.0 }
 0x370   : > { %v1724_v49 = vmax.f32 %v1670_v1, 0.0 }
 0x371   : > { %v3805_v17 = vsel %vm1736_vm1, %v1725_v48, -1e+30 }
 0x372   : > { %1767 = vmax.xlane.f32.xlu1 %v3805_v17  ;;  %v3810_v50 = vsel %vm1736_vm1, %v1724_v49, -1e+30 }
 0x373   : > { %1765 = vmax.xlane.f32.xlu0 %v3810_v50 }
 0x374   : > { %v2148_v2 = vpop.f32.mrb[72].mxu1 }
 0x375   : > { %v1685_v51 = vadd.f32 %v2148_v2, %v3759_v60  ;;  %v1679_v18 = vpop.f32.mrb[73].mxu1 }
 0x376   : > { %v1680_v52 = vadd.f32 %v3759_v60, %v1679_v18 }
 0x377   : > { %v1727_v53 = vmax.f32 %v1685_v51, 0.0 }
 0x378   : > { %v1726_v3 = vmax.f32 %v1680_v52, 0.0 }
 0x379   : > { %v3817_v20 = vsel %vm1736_vm1, %v1727_v53, -1e+30 }
 0x37a   : > { %1771 = vmax.xlane.f32.xlu1 %v3817_v20  ;;  %v3822_v21 = vsel %vm1736_vm1, %v1726_v3, -1e+30 }
 0x37b   : > { %1769 = vmax.xlane.f32.xlu0 %v3822_v21 }
 0x37c   : > { %v2151_v25 = vpop.f32.mrb[74].mxu1 }
 0x37d   : > { %v1695_v26 = vadd.f32 %v2151_v25, %v3759_v60  ;;  %v1689_v57 = vpop.f32.mrb[75].mxu1 }
 0x37e   : > { %v1690_v58 = vadd.f32 %v3759_v60, %v1689_v57 }
 0x37f   : > { %v1729_v54 = vmax.f32 %v1695_v26, 0.0 }
 0x380   : > { %v1728_v19 = vmax.f32 %v1690_v58, 0.0 }
 0x381   : > { %v3829_v22 = vsel %vm1736_vm1, %v1729_v54, -1e+30 }
 0x382   : > { %1775 = vmax.xlane.f32.xlu1 %v3829_v22  ;;  %v3834_v59 = vsel %vm1736_vm1, %v1728_v19, -1e+30 }
 0x383   : > { %1773 = vmax.xlane.f32.xlu0 %v3834_v59 }
 0x384   : > { %v2154_v5 = vpop.f32.mrb[76].mxu1 }
 0x385   : > { %v1705_v23 = vadd.f32 %v2154_v5, %v3759_v60  ;;  %v1699_v55 = vpop.f32.mrb[77].mxu1 }
 0x386   : > { %v1700_v24 = vadd.f32 %v3759_v60, %v1699_v55 }
 0x387   : > { %v1731_v6 = vmax.f32 %v1705_v23, 0.0 }
 0x388   : > { %v1730_v27 = vmax.f32 %v1700_v24, 0.0 }
 0x389   : > { %v3841_v28 = vsel %vm1736_vm1, %v1731_v6, -1e+30 }
 0x38a   : > { %1779 = vmax.xlane.f32.xlu1 %v3841_v28  ;;  %v3846_v56 = vsel %vm1736_vm1, %v1730_v27, -1e+30 }
 0x38b   : > { %1777 = vmax.xlane.f32.xlu0 %v3846_v56 }
 0x38c   : > { %v2157_v7 = vpop.f32.mrb[78].mxu1 }
 0x38d   : > { %v1715_v29 = vadd.f32 %v2157_v7, %v3759_v60  ;;  %v1709_v30 = vpop.f32.mrb[79].mxu1 }
 0x38e   : > { %v1710_v31 = vadd.f32 %v3759_v60, %v1709_v30 }
 0x38f   : > { %v1733_v8 = vmax.f32 %v1715_v29, 0.0 }
 0x390   : > { %v1732_v32 = vmax.f32 %v1710_v31, 0.0 }
 0x391   : > { %v3853_v9 = vsel %vm1736_vm1, %v1733_v8, -1e+30 }
 0x392   : > { %1783 = vmax.xlane.f32.xlu1 %v3853_v9  ;;  %v3858_v34 = vsel %vm1736_vm1, %v1732_v32, -1e+30 }
 0x393   : > { %1781 = vmax.xlane.f32.xlu0 %v3858_v34 }
 0x3e7   : > { %v1756_v35 = vpop.xlane.xlu0 %1755 }
 0x3e8   : > { %v3862_v61 = vsub.f32 %v3769_v36, %v1756_v35 }
 0x3ea   : > { %v1803_v60 = vmul.f32 1.442695, %v3862_v61 }
 0x3eb   : > { %v1754_v4 = vpop.xlane.xlu0 %1753 }
 0x3ec   : > { %2568 = vpow2.f32 %v1803_v60  ;;  %v3866_v10 = vsub.f32 %v3775_v11, %v1754_v4 }
 0x3ee   : > { %v1801_v37 = vmul.f32 1.442695, %v3866_v10 }
 0x3ef   : > { %v1760_v16 = vpop.xlane.xlu1 %1759 }
 0x3f0   : > { %2570 = vpow2.f32 %v1801_v37  ;;  %v3870_v33 = vsub.f32 %v3781_v12, %v1760_v16 }
 0x3f2   : > { %v1807_v38 = vmul.f32 1.442695, %v3870_v33 }
 0x3f3   : > { %v1758_v62 = vpop.xlane.xlu1 %1757 }
 0x3f4   : > { %2572 = vpow2.f32 %v1807_v38  ;;  %v3874_v36 = vsub.f32 %v3787_v13, %v1758_v62 }
 0x3f6   : > { %v2569_v39 = vpop.eup %2568  ;;  %v1805_v40 = vmul.f32 1.442695, %v3874_v36 }
 0x3f7   : > { %1835 = vadd.xlane.f32.xlu1 %v2569_v39  ;;  %v1764_v11 = vpop.xlane.xlu1 %1763 }
 0x3f8   : > { %2574 = vpow2.f32 %v1805_v40  ;;  %v3878_v41 = vsub.f32 %v3793_v14, %v1764_v11  ;;  %v1762_v63 = vpop.xlane.xlu0 %1761 }
 0x3f9   : > { %v3881_v12 = vsub.f32 %v3798_v45, %v1762_v63 }
 0x3fa   : > { %v2571_v42 = vpop.eup %2570  ;;  %v1811_v43 = vmul.f32 1.442695, %v3878_v41 }
 0x3fb   : > { %v1809_v44 = vmul.f32 1.442695, %v3881_v12  ;;  %1833 = vadd.xlane.f32.xlu0 %v2571_v42 }
 0x3fc   : > { %2576 = vpow2.f32 %v1811_v43 }
 0x3fd   : > { %2578 = vpow2.f32 %v1809_v44 }
 0x3fe   : > { %v2573_v13 = vpop.eup %2572 }
 0x3ff   : > { %1839 = vadd.xlane.f32.xlu1 %v2573_v13  ;;  %v1768_v0 = vpop.xlane.xlu1 %1767 }
 0x400   : > { %v3886_v46 = vsub.f32 %v3805_v17, %v1768_v0  ;;  %v1766_v14 = vpop.xlane.xlu0 %1765 }
 0x401   : > { %v3889_v47 = vsub.f32 %v3810_v50, %v1766_v14 }
 0x402   : > { %v2575_v45 = vpop.eup %2574  ;;  %v1815_v15 = vmul.f32 1.442695, %v3886_v46 }
 0x403   : > { %v1813_v1 = vmul.f32 1.442695, %v3889_v47  ;;  %1837 = vadd.xlane.f32.xlu0 %v2575_v45 }
 0x404   : > { %2580 = vpow2.f32 %v1815_v15 }
 0x405   : > { %2582 = vpow2.f32 %v1813_v1 }
 0x406   : > { %v2577_v48 = vpop.eup %2576 }
 0x407   : > { %v2579_v49 = vpop.eup %2578  ;;  %1843 = vadd.xlane.f32.xlu1 %v2577_v48  ;;  %v1772_v2 = vpop.xlane.xlu1 %1771 }
 0x408   : > { %v3894_v51 = vsub.f32 %v3817_v20, %v1772_v2  ;;  %1841 = vadd.xlane.f32.xlu0 %v2579_v49  ;;  %v1770_v17 = vpop.xlane.xlu0 %1769 }
 0x409   : > { %v3897_v50 = vsub.f32 %v3822_v21, %v1770_v17 }
 0x40a   : > { %v1819_v18 = vmul.f32 1.442695, %v3894_v51 }
 0x40b   : > { %v1817_v52 = vmul.f32 1.442695, %v3897_v50 }
 0x40c   : > { %2584 = vpow2.f32 %v1819_v18 }
 0x40d   : > { %2586 = vpow2.f32 %v1817_v52 }
 0x40e   : > { %v2581_v53 = vpop.eup %2580 }
 0x40f   : > { %v2583_v3 = vpop.eup %2582  ;;  %1847 = vadd.xlane.f32.xlu1 %v2581_v53  ;;  %v1776_v25 = vpop.xlane.xlu1 %1775 }
 0x410   : > { %v3902_v26 = vsub.f32 %v3829_v22, %v1776_v25  ;;  %1845 = vadd.xlane.f32.xlu0 %v2583_v3  ;;  %v1774_v20 = vpop.xlane.xlu0 %1773 }
 0x411   : > { %v3905_v57 = vsub.f32 %v3834_v59, %v1774_v20 }
 0x412   : > { %v1823_v21 = vmul.f32 1.442695, %v3902_v26 }
 0x413   : > { %v1821_v58 = vmul.f32 1.442695, %v3905_v57 }
 0x414   : > { %2588 = vpow2.f32 %v1823_v21 }
 0x415   : > { %2590 = vpow2.f32 %v1821_v58 }
 0x416   : > { %v2585_v54 = vpop.eup %2584 }
 0x417   : > { %v2587_v19 = vpop.eup %2586  ;;  %1851 = vadd.xlane.f32.xlu1 %v2585_v54  ;;  %v1780_v5 = vpop.xlane.xlu1 %1779 }
 0x418   : > { %v3910_v23 = vsub.f32 %v3841_v28, %v1780_v5  ;;  %1849 = vadd.xlane.f32.xlu0 %v2587_v19  ;;  %v1778_v22 = vpop.xlane.xlu0 %1777 }
 0x419   : > { %v3913_v55 = vsub.f32 %v3846_v56, %v1778_v22 }
 0x41a   : > { %v1827_v59 = vmul.f32 1.442695, %v3910_v23 }
 0x41b   : > { %v1825_v24 = vmul.f32 1.442695, %v3913_v55 }
 0x41c   : > { %2592 = vpow2.f32 %v1827_v59 }
 0x41d   : > { %2594 = vpow2.f32 %v1825_v24 }
 0x41e   : > { %v2589_v6 = vpop.eup %2588 }
 0x41f   : > { %v2591_v27 = vpop.eup %2590  ;;  %1855 = vadd.xlane.f32.xlu1 %v2589_v6  ;;  %v1784_v7 = vpop.xlane.xlu1 %1783 }
 0x420   : > { %v3918_v29 = vsub.f32 %v3853_v9, %v1784_v7  ;;  %1853 = vadd.xlane.f32.xlu0 %v2591_v27  ;;  %v1782_v28 = vpop.xlane.xlu0 %1781 }
 0x421   : > { %v3921_v30 = vsub.f32 %v3858_v34, %v1782_v28 }
 0x422   : > { %v1831_v56 = vmul.f32 1.442695, %v3918_v29 }
 0x423   : > { %v1829_v31 = vmul.f32 1.442695, %v3921_v30 }
 0x424   : > { %2596 = vpow2.f32 %v1831_v56 }
 0x425   : > { %2598 = vpow2.f32 %v1829_v31 }
 0x426   : > { %v2593_v8 = vpop.eup %2592 }
 0x427   : > { %v2595_v32 = vpop.eup %2594  ;;  %1859 = vadd.xlane.f32.xlu1 %v2593_v8 }
 0x428   : > { %1857 = vadd.xlane.f32.xlu0 %v2595_v32 }
 0x42e   : > { %v2597_v35 = vpop.eup %2596 }
 0x42f   : > { %v2599_v60 = vpop.eup %2598  ;;  %1863 = vadd.xlane.f32.xlu1 %v2597_v35 }
 0x430   : > { %1861 = vadd.xlane.f32.xlu0 %v2599_v60 }
 0x484   : > { %v1836_v9 = vpop.xlane.xlu1 %1835 }
 0x485   : > { %2600 = vlog2.f32 %v1836_v9 }
 0x488   : > { %v1834_v4 = vpop.xlane.xlu0 %1833 }
 0x489   : > { %2602 = vlog2.f32 %v1834_v4 }
 0x48c   : > { %v1840_v34 = vpop.xlane.xlu1 %1839 }
 0x48d   : > { %2604 = vlog2.f32 %v1840_v34 }
 0x48f   : > { %v2601_v37 = vpop.eup %2600 }
 0x490   : > { %v1868_v16 = vmul.f32 0.6931472, %v2601_v37  ;;  %v1838_v38 = vpop.xlane.xlu0 %1837 }
 0x491   : > { %2606 = vlog2.f32 %v1838_v38 }
 0x492   : > { %v1898_v62 = vsub.f32 %v3862_v61, %v1868_v16 }
 0x493   : > { %v2603_v39 = vpop.eup %2602 }
 0x494   : > { %1914 = vst [vmem:[%s3929_s20 + $0x8] sm:$0xff] %v1898_v62  ;;  %v1866_v40 = vmul.f32 0.6931472, %v2603_v39  ;;  %v1844_v11 = vpop.xlane.xlu1 %1843 }
 0x495   : > { %2608 = vlog2.f32 %v1844_v11  ;;  %v1842_v63 = vpop.xlane.xlu0 %1841 }
 0x496   : > { %v1897_v42 = vsub.f32 %v3866_v10, %v1866_v40  ;;  %2610 = vlog2.f32 %v1842_v63 }
 0x497   : > { %v2605_v43 = vpop.eup %2604 }
 0x498   : > { %1913 = vst [vmem:[%s3929_s20] sm:$0xff] %v1897_v42  ;;  %v1872_v44 = vmul.f32 0.6931472, %v2605_v43 }
 0x49a   : > { %v1900_v13 = vsub.f32 %v3870_v33, %v1872_v44 }
 0x49b   : > { %v2607_v0 = vpop.eup %2606 }
 0x49c   : > { %1916 = vst [vmem:[%s3929_s20 + $0x18] sm:$0xff] %v1900_v13  ;;  %v1870_v61 = vmul.f32 0.6931472, %v2607_v0  ;;  %v1848_v14 = vpop.xlane.xlu1 %1847 }
 0x49d   : > { %2612 = vlog2.f32 %v1848_v14  ;;  %v1846_v45 = vpop.xlane.xlu0 %1845 }
 0x49e   : > { %v1899_v15 = vsub.f32 %v3874_v36, %v1870_v61  ;;  %2614 = vlog2.f32 %v1846_v45 }
 0x49f   : > { %v2609_v1 = vpop.eup %2608 }
 0x4a0   : > { %v2611_v10 = vpop.eup %2610  ;;  %1915 = vst [vmem:[%s3929_s20 + $0x10] sm:$0xff] %v1899_v15  ;;  %v1876_v48 = vmul.f32 0.6931472, %v2609_v1 }
 0x4a1   : > { %v1874_v49 = vmul.f32 0.6931472, %v2611_v10 }
 0x4a2   : > { %v1902_v2 = vsub.f32 %v3878_v41, %v1876_v48 }
 0x4a3   : > { %v1901_v33 = vsub.f32 %v3881_v12, %v1874_v49 }
 0x4a4   : > { %1918 = vst [vmem:[%s3929_s20 + $0x28] sm:$0xff] %v1902_v2  ;;  %v1852_v17 = vpop.xlane.xlu1 %1851 }
 0x4a5   : > { %1917 = vst [vmem:[%s3929_s20 + $0x20] sm:$0xff] %v1901_v33  ;;  %2616 = vlog2.f32 %v1852_v17  ;;  %v1850_v18 = vpop.xlane.xlu0 %1849 }
 0x4a6   : > { %2618 = vlog2.f32 %v1850_v18 }
 0x4a7   : > { %v2613_v52 = vpop.eup %2612 }
 0x4a8   : > { %v2615_v36 = vpop.eup %2614  ;;  %v1880_v53 = vmul.f32 0.6931472, %v2613_v52 }
 0x4a9   : > { %v1878_v3 = vmul.f32 0.6931472, %v2615_v36 }
 0x4aa   : > { %v1904_v25 = vsub.f32 %v3886_v46, %v1880_v53 }
 0x4ab   : > { %v1903_v20 = vsub.f32 %v3889_v47, %v1878_v3 }
 0x4ac   : > { %1920 = vst [vmem:[%s3929_s20 + $0x38] sm:$0xff] %v1904_v25  ;;  %v1856_v41 = vpop.xlane.xlu1 %1855 }
 0x4ad   : > { %1919 = vst [vmem:[%s3929_s20 + $0x30] sm:$0xff] %v1903_v20  ;;  %2620 = vlog2.f32 %v1856_v41  ;;  %v1854_v12 = vpop.xlane.xlu0 %1853 }
 0x4ae   : > { %2622 = vlog2.f32 %v1854_v12 }
 0x4af   : > { %v2617_v21 = vpop.eup %2616 }
 0x4b0   : > { %v2619_v58 = vpop.eup %2618  ;;  %v1884_v54 = vmul.f32 0.6931472, %v2617_v21 }
 0x4b1   : > { %v1882_v19 = vmul.f32 0.6931472, %v2619_v58 }
 0x4b2   : > { %v1906_v5 = vsub.f32 %v3894_v51, %v1884_v54 }
 0x4b3   : > { %v1905_v22 = vsub.f32 %v3897_v50, %v1882_v19 }
 0x4b4   : > { %1922 = vst [vmem:[%s3929_s20 + $0x48] sm:$0xff] %v1906_v5  ;;  %v1860_v46 = vpop.xlane.xlu1 %1859 }
 0x4b5   : > { %1921 = vst [vmem:[%s3929_s20 + $0x40] sm:$0xff] %v1905_v22  ;;  %2624 = vlog2.f32 %v1860_v46  ;;  %v1858_v47 = vpop.xlane.xlu0 %1857 }
 0x4b6   : > { %2626 = vlog2.f32 %v1858_v47 }
 0x4b7   : > { %v2621_v59 = vpop.eup %2620 }
 0x4b8   : > { %v2623_v24 = vpop.eup %2622  ;;  %v1888_v6 = vmul.f32 0.6931472, %v2621_v59 }
 0x4b9   : > { %v1886_v27 = vmul.f32 0.6931472, %v2623_v24 }
 0x4ba   : > { %v1908_v7 = vsub.f32 %v3902_v26, %v1888_v6 }
 0x4bb   : > { %v1907_v28 = vsub.f32 %v3905_v57, %v1886_v27 }
 0x4bc   : > { %1924 = vst [vmem:[%s3929_s20 + $0x58] sm:$0xff] %v1908_v7  ;;  %v1864_v51 = vpop.xlane.xlu1 %1863 }
 0x4bd   : > { %1923 = vst [vmem:[%s3929_s20 + $0x50] sm:$0xff] %v1907_v28  ;;  %2628 = vlog2.f32 %v1864_v51  ;;  %v1862_v50 = vpop.xlane.xlu0 %1861 }
 0x4be   : > { %2630 = vlog2.f32 %v1862_v50 }
 0x4bf   : > { %v2625_v56 = vpop.eup %2624 }
 0x4c0   : > { %v2627_v31 = vpop.eup %2626  ;;  %v1892_v8 = vmul.f32 0.6931472, %v2625_v56 }
 0x4c1   : > { %v1890_v32 = vmul.f32 0.6931472, %v2627_v31 }
 0x4c2   : > { %v1910_v35 = vsub.f32 %v3910_v23, %v1892_v8 }
 0x4c3   : > { %v1909_v60 = vsub.f32 %v3913_v55, %v1890_v32 }
 0x4c4   : > { %1926 = vst [vmem:[%s3929_s20 + $0x68] sm:$0xff] %v1910_v35 }
 0x4c5   : > { %1925 = vst [vmem:[%s3929_s20 + $0x60] sm:$0xff] %v1909_v60 }
 0x4c7   : > { %v2629_v26 = vpop.eup %2628 }
 0x4c8   : > { %v2631_v57 = vpop.eup %2630  ;;  %v1896_v9 = vmul.f32 0.6931472, %v2629_v26 }
 0x4c9   : > { %v1894_v4 = vmul.f32 0.6931472, %v2631_v57 }
 0x4ca   : > { %v1912_v34 = vsub.f32 %v3918_v29, %v1896_v9 }
 0x4cb   : > { %v1911_v37 = vsub.f32 %v3921_v30, %v1894_v4 }
 0x4cc   : > { %1928 = vst [vmem:[%s3929_s20 + $0x78] sm:$0xff] %v1912_v34 }
 0x4cd   : > { %1927 = vst [vmem:[%s3929_s20 + $0x70] sm:$0xff] %v1911_v37 }
 0x4ce PF: > { %s17_s24 = sadd.s32 1, %s2638_s24  }
 0x4cf   : > { %p14_p4 = scmp.ge.s32.totalorder %s17_s24, 4  }
 0x4d1   :  { %16 = sbr.rel (!%p14_p4) target bundleno = 1 (0x1), region = 78 }

</bundles_post_ra>
